<compile_context>
chip_gen: v7x
topology: tpu7x:2x2x1
jax: 0.10.0
libtpu: 0.0.40
codegen_flags: <defaults>
</compile_context>

<pallas_src>
import jax
import jax.numpy as jnp
from jax import lax
from jax.experimental import pallas as pl
from jax.experimental.pallas import tpu as pltpu


def lstmnet_kernel(xw_ref, whh_ref, gamma_ref, beta_ref, wfc_ref, bfc_ref,
                   out_ref, h_scr, c_scr):
    t_blk = pl.program_id(0)
    chunk = xw_ref.shape[0]          # timesteps in this grid block

    @pl.when(t_blk == 0)
    def _init():
        h_scr[...] = jnp.zeros_like(h_scr)
        c_scr[...] = jnp.zeros_like(c_scr)

    # Per-gate recurrent weights: each gate is its own (H, H) tile, so the
    # gate math never slices sub-lane chunks out of a (B, 4H) block.
    whh_i = whh_ref[0]
    whh_f = whh_ref[1]
    whh_g = whh_ref[2]
    whh_o = whh_ref[3]

    def step(tt, carry):
        h, c = carry
        pre = xw_ref[tt]             # (4, B, H): x_t @ W_ih + b, precomputed
        gi = pre[0] + jnp.dot(h, whh_i, preferred_element_type=jnp.float32)
        gf = pre[1] + jnp.dot(h, whh_f, preferred_element_type=jnp.float32)
        gg = pre[2] + jnp.dot(h, whh_g, preferred_element_type=jnp.float32)
        go = pre[3] + jnp.dot(h, whh_o, preferred_element_type=jnp.float32)
        i = jax.nn.sigmoid(gi)
        f = jax.nn.sigmoid(gf)
        g = jnp.tanh(gg)
        o = jax.nn.sigmoid(go)
        c_new = f * c + i * g
        h_new = o * jnp.tanh(c_new)
        return h_new, c_new

    # Fully unrolled over the chunk: only the unavoidable h @ W_hh dependence
    # is serialized; unrolling lets the scheduler co-issue across timesteps.
    h_last, c_last = lax.fori_loop(0, chunk, step,
                                   (h_scr[...], c_scr[...]), unroll=True)
    h_scr[...] = h_last
    c_scr[...] = c_last

    @pl.when(t_blk == pl.num_programs(0) - 1)
    def _epilogue():
        # BatchNorm1d in training mode: batch mean, biased variance, eps=1e-5.
        eps = 1e-5
        mean = jnp.mean(h_last, axis=0, keepdims=True)
        var = jnp.mean((h_last - mean) ** 2, axis=0, keepdims=True)
        y = ((h_last - mean) * lax.rsqrt(var + eps)
             * gamma_ref[...] + beta_ref[...])
        # Dropout output is discarded by the original forward -> no-op.
        out_ref[...] = (jnp.dot(y, wfc_ref[...],
                                preferred_element_type=jnp.float32)
                        + bfc_ref[...])


def _pick_chunk(T, max_chunk=16):
    """Largest divisor of T not exceeding max_chunk (timesteps per grid step)."""
    for c in range(min(T, max_chunk), 0, -1):
        if T % c == 0:
            return c
    return 1


def lstmnet_forward(x, params):
    """x: (B, T, D_in) float32 (batch_first, like the PyTorch module)."""
    B, T, D_in = x.shape
    H = params["w_hh"].shape[0]
    n_out = params["w_fc"].shape[1]
    chunk = _pick_chunk(T)
    n_blk = T // chunk

    # Hoist the input projection out of the recurrence; produce it directly in
    # time-major, per-gate layout so the transpose fuses into the matmul.
    w_ih_g = params["w_ih"].reshape(D_in, 4, H)              # (D_in, 4, H)
    b_g = params["b"].reshape(1, 4, 1, H)                    # (1, 4, 1, H)
    xw = jnp.einsum("btd,dgh->tgbh", x, w_ih_g,
                    precision=lax.Precision.HIGHEST) + b_g   # (T, 4, B, H)

    # Recurrent weights per gate: (4, H, H).
    whh_g = params["w_hh"].reshape(H, 4, H).transpose(1, 0, 2)

    # TODO(synk): for v6e/v7x, casting xw / whh_g / w_fc to bfloat16 (keeping
    # f32 accumulation) would double MXU throughput; kept f32 here to stay
    # bit-close to the f32 reference.

    grid_spec = pltpu.PrefetchScalarGridSpec(
        num_scalar_prefetch=0,
        grid=(n_blk,),
        in_specs=[
            # Streamed over T (auto double-buffered); footprint independent of T.
            pl.BlockSpec((chunk, 4, B, H), lambda t: (t, 0, 0, 0)),
            pl.BlockSpec((4, H, H), lambda t: (0, 0, 0)),
            pl.BlockSpec((1, H), lambda t: (0, 0)),
            pl.BlockSpec((1, H), lambda t: (0, 0)),
            pl.BlockSpec((H, n_out), lambda t: (0, 0)),
            pl.BlockSpec((1, n_out), lambda t: (0, 0)),
        ],
        out_specs=pl.BlockSpec((B, n_out), lambda t: (0, 0)),
        scratch_shapes=[
            pltpu.VMEM((B, H), jnp.float32),   # h carry (persists across grid)
            pltpu.VMEM((B, H), jnp.float32),   # c carry
        ],
    )

    return pl.pallas_call(
        lstmnet_kernel,
        out_shape=jax.ShapeDtypeStruct((B, n_out), jnp.float32),
        grid_spec=grid_spec,
        compiler_params=pltpu.CompilerParams(
            dimension_semantics=("arbitrary",)),   # recurrence axis is serial
    )(xw, whh_g, params["gamma"], params["beta"],
      params["w_fc"], params["b_fc"])


def init_params(key, in_channel, hidden_dim, n_output):
    k = jax.random.split(key, 6)
    s_lstm = 1.0 / jnp.sqrt(hidden_dim)
    s_fc = 1.0 / jnp.sqrt(hidden_dim)
    w_ih = jax.random.uniform(k[0], (in_channel, 4 * hidden_dim),
                              jnp.float32, -s_lstm, s_lstm)
    w_hh = jax.random.uniform(k[1], (hidden_dim, 4 * hidden_dim),
                              jnp.float32, -s_lstm, s_lstm)
    b_ih = jax.random.uniform(k[2], (1, 4 * hidden_dim), jnp.float32, -s_lstm, s_lstm)
    b_hh = jax.random.uniform(k[3], (1, 4 * hidden_dim), jnp.float32, -s_lstm, s_lstm)
    w_fc = jax.random.uniform(k[4], (hidden_dim, n_output), jnp.float32, -s_fc, s_fc)
    b_fc = jax.random.uniform(k[5], (1, n_output), jnp.float32, -s_fc, s_fc)
    return dict(
        w_ih=w_ih, w_hh=w_hh, b=b_ih + b_hh,
        gamma=jnp.ones((1, hidden_dim), jnp.float32),
        beta=jnp.zeros((1, hidden_dim), jnp.float32),
        w_fc=w_fc, b_fc=b_fc,
    )


def _reference_forward(x, params):
    """Pure-JAX reference with identical semantics, for a quiet sanity check."""
    B, T, _ = x.shape
    H = params["w_hh"].shape[0]
    h = jnp.zeros((B, H), jnp.float32)
    c = jnp.zeros((B, H), jnp.float32)
    for t in range(T):
        gates = x[:, t, :] @ params["w_ih"] + h @ params["w_hh"] + params["b"]
        i = jax.nn.sigmoid(gates[:, 0 * H:1 * H])
        f = jax.nn.sigmoid(gates[:, 1 * H:2 * H])
        g = jnp.tanh(gates[:, 2 * H:3 * H])
        o = jax.nn.sigmoid(gates[:, 3 * H:4 * H])
        c = f * c + i * g
        h = o * jnp.tanh(c)
    mean = jnp.mean(h, axis=0, keepdims=True)
    var = jnp.mean((h - mean) ** 2, axis=0, keepdims=True)
    y = (h - mean) / jnp.sqrt(var + 1e-5) * params["gamma"] + params["beta"]
    return y @ params["w_fc"] + params["b_fc"]


if __name__ == "__main__":
    B, T = 2, 8
    in_channel, hidden_dim, n_output = 4, 32, 8

    key = jax.random.PRNGKey(0)
    kx, kp = jax.random.split(key)
    x = jax.random.normal(kx, (B, T, in_channel), jnp.float32)
    params = init_params(kp, in_channel, hidden_dim, n_output)

    out = lstmnet_forward(x, params)
    out = jax.block_until_ready(out)

    ref = _reference_forward(x, params)
    assert out.shape == (B, n_output)
    assert jnp.allclose(out, ref, atol=1e-4, rtol=1e-4)

    print("KERNEL_OK")
</pallas_src>

<mosaic_0001>
module attributes {stable_mosaic.version = 11 : i64} {
  func.func @lstmnet_kernel(%arg0: i32, %arg1: memref<8x4x2x32xf32, #tpu.memory_space<vmem>>, %arg2: memref<4x32x32xf32, #tpu.memory_space<vmem>>, %arg3: memref<1x32xf32, #tpu.memory_space<vmem>>, %arg4: memref<1x32xf32, #tpu.memory_space<vmem>>, %arg5: memref<32x8xf32, #tpu.memory_space<vmem>>, %arg6: memref<1x8xf32, #tpu.memory_space<vmem>>, %arg7: memref<2x8xf32, #tpu.memory_space<vmem>>, %arg8: memref<2x32xf32, #tpu.memory_space<vmem>>, %arg9: memref<2x32xf32, #tpu.memory_space<vmem>>) attributes {dimension_semantics = [#tpu.dimension_semantics<arbitrary>], iteration_bounds = array<i64: 1>, scalar_prefetch = 0 : i64, scratch_operands = 2 : i64, tpu.core_type = #tpu.core_type<tc>, window_params = [{transform_indices = @transform_0, window_bounds = array<i64: 8, 4, 2, 32>}, {pipeline_mode = #tpu.pipeline_mode<synchronous>, transform_indices = @transform_1, window_bounds = array<i64: 4, 32, 32>}, {pipeline_mode = #tpu.pipeline_mode<synchronous>, transform_indices = @transform_2, window_bounds = array<i64: 1, 32>}, {pipeline_mode = #tpu.pipeline_mode<synchronous>, transform_indices = @transform_3, window_bounds = array<i64: 1, 32>}, {pipeline_mode = #tpu.pipeline_mode<synchronous>, transform_indices = @transform_4, window_bounds = array<i64: 32, 8>}, {pipeline_mode = #tpu.pipeline_mode<synchronous>, transform_indices = @transform_5, window_bounds = array<i64: 1, 8>}, {pipeline_mode = #tpu.pipeline_mode<synchronous>, transform_indices = @transform_6, window_bounds = array<i64: 2, 8>}]} {
    %c0_i32 = arith.constant 0 : i32
    %0 = arith.cmpi eq, %arg0, %c0_i32 : i32
    %1 = arith.extui %0 : i1 to i32
    %c0_i32_0 = arith.constant 0 : i32
    %2 = arith.cmpi ne, %1, %c0_i32_0 : i32
    scf.if %2 {
      %cst_99 = arith.constant 0.000000e+00 : f32
      %338 = vector.broadcast %cst_99 : f32 to vector<2x32xf32>
      %c0_100 = arith.constant 0 : index
      %c0_101 = arith.constant 0 : index
      %339 = vector.load %arg8[%c0_100, %c0_101] : memref<2x32xf32, #tpu.memory_space<vmem>>, vector<2x32xf32>
      tpu.vector_store %arg8[%c0_100, %c0_101], %338 {strides = array<i32>} : memref<2x32xf32, #tpu.memory_space<vmem>>, vector<2x32xf32>,
      %cst_102 = arith.constant 0.000000e+00 : f32
      %340 = vector.broadcast %cst_102 : f32 to vector<2x32xf32>
      %c0_103 = arith.constant 0 : index
      %c0_104 = arith.constant 0 : index
      %341 = vector.load %arg9[%c0_103, %c0_104] : memref<2x32xf32, #tpu.memory_space<vmem>>, vector<2x32xf32>
      tpu.vector_store %arg9[%c0_103, %c0_104], %340 {strides = array<i32>} : memref<2x32xf32, #tpu.memory_space<vmem>>, vector<2x32xf32>,
    } else {
    }
    %c0 = arith.constant 0 : index
    %c0_1 = arith.constant 0 : index
    %c0_2 = arith.constant 0 : index
    %3 = vector.load %arg2[%c0, %c0_1, %c0_2] : memref<4x32x32xf32, #tpu.memory_space<vmem>>, vector<1x32x32xf32>
    %4 = vector.shape_cast %3 : vector<1x32x32xf32> to vector<32x32xf32>
    %c1 = arith.constant 1 : index
    %c0_3 = arith.constant 0 : index
    %c0_4 = arith.constant 0 : index
    %5 = vector.load %arg2[%c1, %c0_3, %c0_4] : memref<4x32x32xf32, #tpu.memory_space<vmem>>, vector<1x32x32xf32>
    %6 = vector.shape_cast %5 : vector<1x32x32xf32> to vector<32x32xf32>
    %c2 = arith.constant 2 : index
    %c0_5 = arith.constant 0 : index
    %c0_6 = arith.constant 0 : index
    %7 = vector.load %arg2[%c2, %c0_5, %c0_6] : memref<4x32x32xf32, #tpu.memory_space<vmem>>, vector<1x32x32xf32>
    %8 = vector.shape_cast %7 : vector<1x32x32xf32> to vector<32x32xf32>
    %c3 = arith.constant 3 : index
    %c0_7 = arith.constant 0 : index
    %c0_8 = arith.constant 0 : index
    %9 = vector.load %arg2[%c3, %c0_7, %c0_8] : memref<4x32x32xf32, #tpu.memory_space<vmem>>, vector<1x32x32xf32>
    %10 = vector.shape_cast %9 : vector<1x32x32xf32> to vector<32x32xf32>
    %c0_9 = arith.constant 0 : index
    %c0_10 = arith.constant 0 : index
    %11 = vector.load %arg8[%c0_9, %c0_10] : memref<2x32xf32, #tpu.memory_space<vmem>>, vector<2x32xf32>
    %c0_11 = arith.constant 0 : index
    %c0_12 = arith.constant 0 : index
    %12 = vector.load %arg9[%c0_11, %c0_12] : memref<2x32xf32, #tpu.memory_space<vmem>>, vector<2x32xf32>
    %c0_i32_13 = arith.constant 0 : i32
    %13 = arith.index_cast %c0_i32_13 : i32 to index
    %c0_14 = arith.constant 0 : index
    %c0_15 = arith.constant 0 : index
    %c0_16 = arith.constant 0 : index
    %14 = vector.load %arg1[%13, %c0_14, %c0_15, %c0_16] : memref<8x4x2x32xf32, #tpu.memory_space<vmem>>, vector<1x4x2x32xf32>
    %15 = vector.shape_cast %14 : vector<1x4x2x32xf32> to vector<4x2x32xf32>
    %16 = vector.extract_strided_slice %15 {offsets = [0, 0, 0], sizes = [1, 2, 32], strides = [1, 1, 1]} : vector<4x2x32xf32> to vector<1x2x32xf32>
    %17 = vector.shape_cast %16 : vector<1x2x32xf32> to vector<2x32xf32>
    %cst = arith.constant dense<0.000000e+00> : vector<2x32xf32>
    %18 = tpu.matmul %11, %4, %cst {dimension_numbers = #tpu.dot_dimension_numbers<[1], [0], [0], [1], [0, 0, 1, 1], [], []>} : vector<2x32xf32>, vector<32x32xf32>, vector<2x32xf32> -> vector<2x32xf32>
    %19 = arith.addf %17, %18 : vector<2x32xf32>
    %20 = vector.extract_strided_slice %15 {offsets = [1, 0, 0], sizes = [1, 2, 32], strides = [1, 1, 1]} : vector<4x2x32xf32> to vector<1x2x32xf32>
    %21 = vector.shape_cast %20 : vector<1x2x32xf32> to vector<2x32xf32>
    %cst_17 = arith.constant dense<0.000000e+00> : vector<2x32xf32>
    %22 = tpu.matmul %11, %6, %cst_17 {dimension_numbers = #tpu.dot_dimension_numbers<[1], [0], [0], [1], [0, 0, 1, 1], [], []>} : vector<2x32xf32>, vector<32x32xf32>, vector<2x32xf32> -> vector<2x32xf32>
    %23 = arith.addf %21, %22 : vector<2x32xf32>
    %24 = vector.extract_strided_slice %15 {offsets = [2, 0, 0], sizes = [1, 2, 32], strides = [1, 1, 1]} : vector<4x2x32xf32> to vector<1x2x32xf32>
    %25 = vector.shape_cast %24 : vector<1x2x32xf32> to vector<2x32xf32>
    %cst_18 = arith.constant dense<0.000000e+00> : vector<2x32xf32>
    %26 = tpu.matmul %11, %8, %cst_18 {dimension_numbers = #tpu.dot_dimension_numbers<[1], [0], [0], [1], [0, 0, 1, 1], [], []>} : vector<2x32xf32>, vector<32x32xf32>, vector<2x32xf32> -> vector<2x32xf32>
    %27 = arith.addf %25, %26 : vector<2x32xf32>
    %28 = vector.extract_strided_slice %15 {offsets = [3, 0, 0], sizes = [1, 2, 32], strides = [1, 1, 1]} : vector<4x2x32xf32> to vector<1x2x32xf32>
    %29 = vector.shape_cast %28 : vector<1x2x32xf32> to vector<2x32xf32>
    %cst_19 = arith.constant dense<0.000000e+00> : vector<2x32xf32>
    %30 = tpu.matmul %11, %10, %cst_19 {dimension_numbers = #tpu.dot_dimension_numbers<[1], [0], [0], [1], [0, 0, 1, 1], [], []>} : vector<2x32xf32>, vector<32x32xf32>, vector<2x32xf32> -> vector<2x32xf32>
    %31 = arith.addf %29, %30 : vector<2x32xf32>
    %32 = arith.negf %19 : vector<2x32xf32>
    %33 = math.exp %32 : vector<2x32xf32>
    %cst_20 = arith.constant 1.000000e+00 : f32
    %34 = vector.broadcast %cst_20 : f32 to vector<2x32xf32>
    %35 = arith.addf %34, %33 : vector<2x32xf32>
    %36 = arith.divf %34, %35 : vector<2x32xf32>
    %37 = arith.negf %23 : vector<2x32xf32>
    %38 = math.exp %37 : vector<2x32xf32>
    %cst_21 = arith.constant 1.000000e+00 : f32
    %39 = vector.broadcast %cst_21 : f32 to vector<2x32xf32>
    %40 = arith.addf %39, %38 : vector<2x32xf32>
    %41 = arith.divf %39, %40 : vector<2x32xf32>
    %42 = math.tanh %27 : vector<2x32xf32>
    %43 = arith.negf %31 : vector<2x32xf32>
    %44 = math.exp %43 : vector<2x32xf32>
    %cst_22 = arith.constant 1.000000e+00 : f32
    %45 = vector.broadcast %cst_22 : f32 to vector<2x32xf32>
    %46 = arith.addf %45, %44 : vector<2x32xf32>
    %47 = arith.divf %45, %46 : vector<2x32xf32>
    %48 = arith.mulf %41, %12 : vector<2x32xf32>
    %49 = arith.mulf %36, %42 : vector<2x32xf32>
    %50 = arith.addf %48, %49 : vector<2x32xf32>
    %51 = math.tanh %50 : vector<2x32xf32>
    %52 = arith.mulf %47, %51 : vector<2x32xf32>
    %c1_i32 = arith.constant 1 : i32
    %53 = arith.index_cast %c1_i32 : i32 to index
    %c0_23 = arith.constant 0 : index
    %c0_24 = arith.constant 0 : index
    %c0_25 = arith.constant 0 : index
    %54 = vector.load %arg1[%53, %c0_23, %c0_24, %c0_25] : memref<8x4x2x32xf32, #tpu.memory_space<vmem>>, vector<1x4x2x32xf32>
    %55 = vector.shape_cast %54 : vector<1x4x2x32xf32> to vector<4x2x32xf32>
    %56 = vector.extract_strided_slice %55 {offsets = [0, 0, 0], sizes = [1, 2, 32], strides = [1, 1, 1]} : vector<4x2x32xf32> to vector<1x2x32xf32>
    %57 = vector.shape_cast %56 : vector<1x2x32xf32> to vector<2x32xf32>
    %cst_26 = arith.constant dense<0.000000e+00> : vector<2x32xf32>
    %58 = tpu.matmul %52, %4, %cst_26 {dimension_numbers = #tpu.dot_dimension_numbers<[1], [0], [0], [1], [0, 0, 1, 1], [], []>} : vector<2x32xf32>, vector<32x32xf32>, vector<2x32xf32> -> vector<2x32xf32>
    %59 = arith.addf %57, %58 : vector<2x32xf32>
    %60 = vector.extract_strided_slice %55 {offsets = [1, 0, 0], sizes = [1, 2, 32], strides = [1, 1, 1]} : vector<4x2x32xf32> to vector<1x2x32xf32>
    %61 = vector.shape_cast %60 : vector<1x2x32xf32> to vector<2x32xf32>
    %cst_27 = arith.constant dense<0.000000e+00> : vector<2x32xf32>
    %62 = tpu.matmul %52, %6, %cst_27 {dimension_numbers = #tpu.dot_dimension_numbers<[1], [0], [0], [1], [0, 0, 1, 1], [], []>} : vector<2x32xf32>, vector<32x32xf32>, vector<2x32xf32> -> vector<2x32xf32>
    %63 = arith.addf %61, %62 : vector<2x32xf32>
    %64 = vector.extract_strided_slice %55 {offsets = [2, 0, 0], sizes = [1, 2, 32], strides = [1, 1, 1]} : vector<4x2x32xf32> to vector<1x2x32xf32>
    %65 = vector.shape_cast %64 : vector<1x2x32xf32> to vector<2x32xf32>
    %cst_28 = arith.constant dense<0.000000e+00> : vector<2x32xf32>
    %66 = tpu.matmul %52, %8, %cst_28 {dimension_numbers = #tpu.dot_dimension_numbers<[1], [0], [0], [1], [0, 0, 1, 1], [], []>} : vector<2x32xf32>, vector<32x32xf32>, vector<2x32xf32> -> vector<2x32xf32>
    %67 = arith.addf %65, %66 : vector<2x32xf32>
    %68 = vector.extract_strided_slice %55 {offsets = [3, 0, 0], sizes = [1, 2, 32], strides = [1, 1, 1]} : vector<4x2x32xf32> to vector<1x2x32xf32>
    %69 = vector.shape_cast %68 : vector<1x2x32xf32> to vector<2x32xf32>
    %cst_29 = arith.constant dense<0.000000e+00> : vector<2x32xf32>
    %70 = tpu.matmul %52, %10, %cst_29 {dimension_numbers = #tpu.dot_dimension_numbers<[1], [0], [0], [1], [0, 0, 1, 1], [], []>} : vector<2x32xf32>, vector<32x32xf32>, vector<2x32xf32> -> vector<2x32xf32>
    %71 = arith.addf %69, %70 : vector<2x32xf32>
    %72 = arith.negf %59 : vector<2x32xf32>
    %73 = math.exp %72 : vector<2x32xf32>
    %cst_30 = arith.constant 1.000000e+00 : f32
    %74 = vector.broadcast %cst_30 : f32 to vector<2x32xf32>
    %75 = arith.addf %74, %73 : vector<2x32xf32>
    %76 = arith.divf %74, %75 : vector<2x32xf32>
    %77 = arith.negf %63 : vector<2x32xf32>
    %78 = math.exp %77 : vector<2x32xf32>
    %cst_31 = arith.constant 1.000000e+00 : f32
    %79 = vector.broadcast %cst_31 : f32 to vector<2x32xf32>
    %80 = arith.addf %79, %78 : vector<2x32xf32>
    %81 = arith.divf %79, %80 : vector<2x32xf32>
    %82 = math.tanh %67 : vector<2x32xf32>
    %83 = arith.negf %71 : vector<2x32xf32>
    %84 = math.exp %83 : vector<2x32xf32>
    %cst_32 = arith.constant 1.000000e+00 : f32
    %85 = vector.broadcast %cst_32 : f32 to vector<2x32xf32>
    %86 = arith.addf %85, %84 : vector<2x32xf32>
    %87 = arith.divf %85, %86 : vector<2x32xf32>
    %88 = arith.mulf %81, %50 : vector<2x32xf32>
    %89 = arith.mulf %76, %82 : vector<2x32xf32>
    %90 = arith.addf %88, %89 : vector<2x32xf32>
    %91 = math.tanh %90 : vector<2x32xf32>
    %92 = arith.mulf %87, %91 : vector<2x32xf32>
    %c2_i32 = arith.constant 2 : i32
    %93 = arith.index_cast %c2_i32 : i32 to index
    %c0_33 = arith.constant 0 : index
    %c0_34 = arith.constant 0 : index
    %c0_35 = arith.constant 0 : index
    %94 = vector.load %arg1[%93, %c0_33, %c0_34, %c0_35] : memref<8x4x2x32xf32, #tpu.memory_space<vmem>>, vector<1x4x2x32xf32>
    %95 = vector.shape_cast %94 : vector<1x4x2x32xf32> to vector<4x2x32xf32>
    %96 = vector.extract_strided_slice %95 {offsets = [0, 0, 0], sizes = [1, 2, 32], strides = [1, 1, 1]} : vector<4x2x32xf32> to vector<1x2x32xf32>
    %97 = vector.shape_cast %96 : vector<1x2x32xf32> to vector<2x32xf32>
    %cst_36 = arith.constant dense<0.000000e+00> : vector<2x32xf32>
    %98 = tpu.matmul %92, %4, %cst_36 {dimension_numbers = #tpu.dot_dimension_numbers<[1], [0], [0], [1], [0, 0, 1, 1], [], []>} : vector<2x32xf32>, vector<32x32xf32>, vector<2x32xf32> -> vector<2x32xf32>
    %99 = arith.addf %97, %98 : vector<2x32xf32>
    %100 = vector.extract_strided_slice %95 {offsets = [1, 0, 0], sizes = [1, 2, 32], strides = [1, 1, 1]} : vector<4x2x32xf32> to vector<1x2x32xf32>
    %101 = vector.shape_cast %100 : vector<1x2x32xf32> to vector<2x32xf32>
    %cst_37 = arith.constant dense<0.000000e+00> : vector<2x32xf32>
    %102 = tpu.matmul %92, %6, %cst_37 {dimension_numbers = #tpu.dot_dimension_numbers<[1], [0], [0], [1], [0, 0, 1, 1], [], []>} : vector<2x32xf32>, vector<32x32xf32>, vector<2x32xf32> -> vector<2x32xf32>
    %103 = arith.addf %101, %102 : vector<2x32xf32>
    %104 = vector.extract_strided_slice %95 {offsets = [2, 0, 0], sizes = [1, 2, 32], strides = [1, 1, 1]} : vector<4x2x32xf32> to vector<1x2x32xf32>
    %105 = vector.shape_cast %104 : vector<1x2x32xf32> to vector<2x32xf32>
    %cst_38 = arith.constant dense<0.000000e+00> : vector<2x32xf32>
    %106 = tpu.matmul %92, %8, %cst_38 {dimension_numbers = #tpu.dot_dimension_numbers<[1], [0], [0], [1], [0, 0, 1, 1], [], []>} : vector<2x32xf32>, vector<32x32xf32>, vector<2x32xf32> -> vector<2x32xf32>
    %107 = arith.addf %105, %106 : vector<2x32xf32>
    %108 = vector.extract_strided_slice %95 {offsets = [3, 0, 0], sizes = [1, 2, 32], strides = [1, 1, 1]} : vector<4x2x32xf32> to vector<1x2x32xf32>
    %109 = vector.shape_cast %108 : vector<1x2x32xf32> to vector<2x32xf32>
    %cst_39 = arith.constant dense<0.000000e+00> : vector<2x32xf32>
    %110 = tpu.matmul %92, %10, %cst_39 {dimension_numbers = #tpu.dot_dimension_numbers<[1], [0], [0], [1], [0, 0, 1, 1], [], []>} : vector<2x32xf32>, vector<32x32xf32>, vector<2x32xf32> -> vector<2x32xf32>
    %111 = arith.addf %109, %110 : vector<2x32xf32>
    %112 = arith.negf %99 : vector<2x32xf32>
    %113 = math.exp %112 : vector<2x32xf32>
    %cst_40 = arith.constant 1.000000e+00 : f32
    %114 = vector.broadcast %cst_40 : f32 to vector<2x32xf32>
    %115 = arith.addf %114, %113 : vector<2x32xf32>
    %116 = arith.divf %114, %115 : vector<2x32xf32>
    %117 = arith.negf %103 : vector<2x32xf32>
    %118 = math.exp %117 : vector<2x32xf32>
    %cst_41 = arith.constant 1.000000e+00 : f32
    %119 = vector.broadcast %cst_41 : f32 to vector<2x32xf32>
    %120 = arith.addf %119, %118 : vector<2x32xf32>
    %121 = arith.divf %119, %120 : vector<2x32xf32>
    %122 = math.tanh %107 : vector<2x32xf32>
    %123 = arith.negf %111 : vector<2x32xf32>
    %124 = math.exp %123 : vector<2x32xf32>
    %cst_42 = arith.constant 1.000000e+00 : f32
    %125 = vector.broadcast %cst_42 : f32 to vector<2x32xf32>
    %126 = arith.addf %125, %124 : vector<2x32xf32>
    %127 = arith.divf %125, %126 : vector<2x32xf32>
    %128 = arith.mulf %121, %90 : vector<2x32xf32>
    %129 = arith.mulf %116, %122 : vector<2x32xf32>
    %130 = arith.addf %128, %129 : vector<2x32xf32>
    %131 = math.tanh %130 : vector<2x32xf32>
    %132 = arith.mulf %127, %131 : vector<2x32xf32>
    %c3_i32 = arith.constant 3 : i32
    %133 = arith.index_cast %c3_i32 : i32 to index
    %c0_43 = arith.constant 0 : index
    %c0_44 = arith.constant 0 : index
    %c0_45 = arith.constant 0 : index
    %134 = vector.load %arg1[%133, %c0_43, %c0_44, %c0_45] : memref<8x4x2x32xf32, #tpu.memory_space<vmem>>, vector<1x4x2x32xf32>
    %135 = vector.shape_cast %134 : vector<1x4x2x32xf32> to vector<4x2x32xf32>
    %136 = vector.extract_strided_slice %135 {offsets = [0, 0, 0], sizes = [1, 2, 32], strides = [1, 1, 1]} : vector<4x2x32xf32> to vector<1x2x32xf32>
    %137 = vector.shape_cast %136 : vector<1x2x32xf32> to vector<2x32xf32>
    %cst_46 = arith.constant dense<0.000000e+00> : vector<2x32xf32>
    %138 = tpu.matmul %132, %4, %cst_46 {dimension_numbers = #tpu.dot_dimension_numbers<[1], [0], [0], [1], [0, 0, 1, 1], [], []>} : vector<2x32xf32>, vector<32x32xf32>, vector<2x32xf32> -> vector<2x32xf32>
    %139 = arith.addf %137, %138 : vector<2x32xf32>
    %140 = vector.extract_strided_slice %135 {offsets = [1, 0, 0], sizes = [1, 2, 32], strides = [1, 1, 1]} : vector<4x2x32xf32> to vector<1x2x32xf32>
    %141 = vector.shape_cast %140 : vector<1x2x32xf32> to vector<2x32xf32>
    %cst_47 = arith.constant dense<0.000000e+00> : vector<2x32xf32>
    %142 = tpu.matmul %132, %6, %cst_47 {dimension_numbers = #tpu.dot_dimension_numbers<[1], [0], [0], [1], [0, 0, 1, 1], [], []>} : vector<2x32xf32>, vector<32x32xf32>, vector<2x32xf32> -> vector<2x32xf32>
    %143 = arith.addf %141, %142 : vector<2x32xf32>
    %144 = vector.extract_strided_slice %135 {offsets = [2, 0, 0], sizes = [1, 2, 32], strides = [1, 1, 1]} : vector<4x2x32xf32> to vector<1x2x32xf32>
    %145 = vector.shape_cast %144 : vector<1x2x32xf32> to vector<2x32xf32>
    %cst_48 = arith.constant dense<0.000000e+00> : vector<2x32xf32>
    %146 = tpu.matmul %132, %8, %cst_48 {dimension_numbers = #tpu.dot_dimension_numbers<[1], [0], [0], [1], [0, 0, 1, 1], [], []>} : vector<2x32xf32>, vector<32x32xf32>, vector<2x32xf32> -> vector<2x32xf32>
    %147 = arith.addf %145, %146 : vector<2x32xf32>
    %148 = vector.extract_strided_slice %135 {offsets = [3, 0, 0], sizes = [1, 2, 32], strides = [1, 1, 1]} : vector<4x2x32xf32> to vector<1x2x32xf32>
    %149 = vector.shape_cast %148 : vector<1x2x32xf32> to vector<2x32xf32>
    %cst_49 = arith.constant dense<0.000000e+00> : vector<2x32xf32>
    %150 = tpu.matmul %132, %10, %cst_49 {dimension_numbers = #tpu.dot_dimension_numbers<[1], [0], [0], [1], [0, 0, 1, 1], [], []>} : vector<2x32xf32>, vector<32x32xf32>, vector<2x32xf32> -> vector<2x32xf32>
    %151 = arith.addf %149, %150 : vector<2x32xf32>
    %152 = arith.negf %139 : vector<2x32xf32>
    %153 = math.exp %152 : vector<2x32xf32>
    %cst_50 = arith.constant 1.000000e+00 : f32
    %154 = vector.broadcast %cst_50 : f32 to vector<2x32xf32>
    %155 = arith.addf %154, %153 : vector<2x32xf32>
    %156 = arith.divf %154, %155 : vector<2x32xf32>
    %157 = arith.negf %143 : vector<2x32xf32>
    %158 = math.exp %157 : vector<2x32xf32>
    %cst_51 = arith.constant 1.000000e+00 : f32
    %159 = vector.broadcast %cst_51 : f32 to vector<2x32xf32>
    %160 = arith.addf %159, %158 : vector<2x32xf32>
    %161 = arith.divf %159, %160 : vector<2x32xf32>
    %162 = math.tanh %147 : vector<2x32xf32>
    %163 = arith.negf %151 : vector<2x32xf32>
    %164 = math.exp %163 : vector<2x32xf32>
    %cst_52 = arith.constant 1.000000e+00 : f32
    %165 = vector.broadcast %cst_52 : f32 to vector<2x32xf32>
    %166 = arith.addf %165, %164 : vector<2x32xf32>
    %167 = arith.divf %165, %166 : vector<2x32xf32>
    %168 = arith.mulf %161, %130 : vector<2x32xf32>
    %169 = arith.mulf %156, %162 : vector<2x32xf32>
    %170 = arith.addf %168, %169 : vector<2x32xf32>
    %171 = math.tanh %170 : vector<2x32xf32>
    %172 = arith.mulf %167, %171 : vector<2x32xf32>
    %c4_i32 = arith.constant 4 : i32
    %173 = arith.index_cast %c4_i32 : i32 to index
    %c0_53 = arith.constant 0 : index
    %c0_54 = arith.constant 0 : index
    %c0_55 = arith.constant 0 : index
    %174 = vector.load %arg1[%173, %c0_53, %c0_54, %c0_55] : memref<8x4x2x32xf32, #tpu.memory_space<vmem>>, vector<1x4x2x32xf32>
    %175 = vector.shape_cast %174 : vector<1x4x2x32xf32> to vector<4x2x32xf32>
    %176 = vector.extract_strided_slice %175 {offsets = [0, 0, 0], sizes = [1, 2, 32], strides = [1, 1, 1]} : vector<4x2x32xf32> to vector<1x2x32xf32>
    %177 = vector.shape_cast %176 : vector<1x2x32xf32> to vector<2x32xf32>
    %cst_56 = arith.constant dense<0.000000e+00> : vector<2x32xf32>
    %178 = tpu.matmul %172, %4, %cst_56 {dimension_numbers = #tpu.dot_dimension_numbers<[1], [0], [0], [1], [0, 0, 1, 1], [], []>} : vector<2x32xf32>, vector<32x32xf32>, vector<2x32xf32> -> vector<2x32xf32>
    %179 = arith.addf %177, %178 : vector<2x32xf32>
    %180 = vector.extract_strided_slice %175 {offsets = [1, 0, 0], sizes = [1, 2, 32], strides = [1, 1, 1]} : vector<4x2x32xf32> to vector<1x2x32xf32>
    %181 = vector.shape_cast %180 : vector<1x2x32xf32> to vector<2x32xf32>
    %cst_57 = arith.constant dense<0.000000e+00> : vector<2x32xf32>
    %182 = tpu.matmul %172, %6, %cst_57 {dimension_numbers = #tpu.dot_dimension_numbers<[1], [0], [0], [1], [0, 0, 1, 1], [], []>} : vector<2x32xf32>, vector<32x32xf32>, vector<2x32xf32> -> vector<2x32xf32>
    %183 = arith.addf %181, %182 : vector<2x32xf32>
    %184 = vector.extract_strided_slice %175 {offsets = [2, 0, 0], sizes = [1, 2, 32], strides = [1, 1, 1]} : vector<4x2x32xf32> to vector<1x2x32xf32>
    %185 = vector.shape_cast %184 : vector<1x2x32xf32> to vector<2x32xf32>
    %cst_58 = arith.constant dense<0.000000e+00> : vector<2x32xf32>
    %186 = tpu.matmul %172, %8, %cst_58 {dimension_numbers = #tpu.dot_dimension_numbers<[1], [0], [0], [1], [0, 0, 1, 1], [], []>} : vector<2x32xf32>, vector<32x32xf32>, vector<2x32xf32> -> vector<2x32xf32>
    %187 = arith.addf %185, %186 : vector<2x32xf32>
    %188 = vector.extract_strided_slice %175 {offsets = [3, 0, 0], sizes = [1, 2, 32], strides = [1, 1, 1]} : vector<4x2x32xf32> to vector<1x2x32xf32>
    %189 = vector.shape_cast %188 : vector<1x2x32xf32> to vector<2x32xf32>
    %cst_59 = arith.constant dense<0.000000e+00> : vector<2x32xf32>
    %190 = tpu.matmul %172, %10, %cst_59 {dimension_numbers = #tpu.dot_dimension_numbers<[1], [0], [0], [1], [0, 0, 1, 1], [], []>} : vector<2x32xf32>, vector<32x32xf32>, vector<2x32xf32> -> vector<2x32xf32>
    %191 = arith.addf %189, %190 : vector<2x32xf32>
    %192 = arith.negf %179 : vector<2x32xf32>
    %193 = math.exp %192 : vector<2x32xf32>
    %cst_60 = arith.constant 1.000000e+00 : f32
    %194 = vector.broadcast %cst_60 : f32 to vector<2x32xf32>
    %195 = arith.addf %194, %193 : vector<2x32xf32>
    %196 = arith.divf %194, %195 : vector<2x32xf32>
    %197 = arith.negf %183 : vector<2x32xf32>
    %198 = math.exp %197 : vector<2x32xf32>
    %cst_61 = arith.constant 1.000000e+00 : f32
    %199 = vector.broadcast %cst_61 : f32 to vector<2x32xf32>
    %200 = arith.addf %199, %198 : vector<2x32xf32>
    %201 = arith.divf %199, %200 : vector<2x32xf32>
    %202 = math.tanh %187 : vector<2x32xf32>
    %203 = arith.negf %191 : vector<2x32xf32>
    %204 = math.exp %203 : vector<2x32xf32>
    %cst_62 = arith.constant 1.000000e+00 : f32
    %205 = vector.broadcast %cst_62 : f32 to vector<2x32xf32>
    %206 = arith.addf %205, %204 : vector<2x32xf32>
    %207 = arith.divf %205, %206 : vector<2x32xf32>
    %208 = arith.mulf %201, %170 : vector<2x32xf32>
    %209 = arith.mulf %196, %202 : vector<2x32xf32>
    %210 = arith.addf %208, %209 : vector<2x32xf32>
    %211 = math.tanh %210 : vector<2x32xf32>
    %212 = arith.mulf %207, %211 : vector<2x32xf32>
    %c5_i32 = arith.constant 5 : i32
    %213 = arith.index_cast %c5_i32 : i32 to index
    %c0_63 = arith.constant 0 : index
    %c0_64 = arith.constant 0 : index
    %c0_65 = arith.constant 0 : index
    %214 = vector.load %arg1[%213, %c0_63, %c0_64, %c0_65] : memref<8x4x2x32xf32, #tpu.memory_space<vmem>>, vector<1x4x2x32xf32>
    %215 = vector.shape_cast %214 : vector<1x4x2x32xf32> to vector<4x2x32xf32>
    %216 = vector.extract_strided_slice %215 {offsets = [0, 0, 0], sizes = [1, 2, 32], strides = [1, 1, 1]} : vector<4x2x32xf32> to vector<1x2x32xf32>
    %217 = vector.shape_cast %216 : vector<1x2x32xf32> to vector<2x32xf32>
    %cst_66 = arith.constant dense<0.000000e+00> : vector<2x32xf32>
    %218 = tpu.matmul %212, %4, %cst_66 {dimension_numbers = #tpu.dot_dimension_numbers<[1], [0], [0], [1], [0, 0, 1, 1], [], []>} : vector<2x32xf32>, vector<32x32xf32>, vector<2x32xf32> -> vector<2x32xf32>
    %219 = arith.addf %217, %218 : vector<2x32xf32>
    %220 = vector.extract_strided_slice %215 {offsets = [1, 0, 0], sizes = [1, 2, 32], strides = [1, 1, 1]} : vector<4x2x32xf32> to vector<1x2x32xf32>
    %221 = vector.shape_cast %220 : vector<1x2x32xf32> to vector<2x32xf32>
    %cst_67 = arith.constant dense<0.000000e+00> : vector<2x32xf32>
    %222 = tpu.matmul %212, %6, %cst_67 {dimension_numbers = #tpu.dot_dimension_numbers<[1], [0], [0], [1], [0, 0, 1, 1], [], []>} : vector<2x32xf32>, vector<32x32xf32>, vector<2x32xf32> -> vector<2x32xf32>
    %223 = arith.addf %221, %222 : vector<2x32xf32>
    %224 = vector.extract_strided_slice %215 {offsets = [2, 0, 0], sizes = [1, 2, 32], strides = [1, 1, 1]} : vector<4x2x32xf32> to vector<1x2x32xf32>
    %225 = vector.shape_cast %224 : vector<1x2x32xf32> to vector<2x32xf32>
    %cst_68 = arith.constant dense<0.000000e+00> : vector<2x32xf32>
    %226 = tpu.matmul %212, %8, %cst_68 {dimension_numbers = #tpu.dot_dimension_numbers<[1], [0], [0], [1], [0, 0, 1, 1], [], []>} : vector<2x32xf32>, vector<32x32xf32>, vector<2x32xf32> -> vector<2x32xf32>
    %227 = arith.addf %225, %226 : vector<2x32xf32>
    %228 = vector.extract_strided_slice %215 {offsets = [3, 0, 0], sizes = [1, 2, 32], strides = [1, 1, 1]} : vector<4x2x32xf32> to vector<1x2x32xf32>
    %229 = vector.shape_cast %228 : vector<1x2x32xf32> to vector<2x32xf32>
    %cst_69 = arith.constant dense<0.000000e+00> : vector<2x32xf32>
    %230 = tpu.matmul %212, %10, %cst_69 {dimension_numbers = #tpu.dot_dimension_numbers<[1], [0], [0], [1], [0, 0, 1, 1], [], []>} : vector<2x32xf32>, vector<32x32xf32>, vector<2x32xf32> -> vector<2x32xf32>
    %231 = arith.addf %229, %230 : vector<2x32xf32>
    %232 = arith.negf %219 : vector<2x32xf32>
    %233 = math.exp %232 : vector<2x32xf32>
    %cst_70 = arith.constant 1.000000e+00 : f32
    %234 = vector.broadcast %cst_70 : f32 to vector<2x32xf32>
    %235 = arith.addf %234, %233 : vector<2x32xf32>
    %236 = arith.divf %234, %235 : vector<2x32xf32>
    %237 = arith.negf %223 : vector<2x32xf32>
    %238 = math.exp %237 : vector<2x32xf32>
    %cst_71 = arith.constant 1.000000e+00 : f32
    %239 = vector.broadcast %cst_71 : f32 to vector<2x32xf32>
    %240 = arith.addf %239, %238 : vector<2x32xf32>
    %241 = arith.divf %239, %240 : vector<2x32xf32>
    %242 = math.tanh %227 : vector<2x32xf32>
    %243 = arith.negf %231 : vector<2x32xf32>
    %244 = math.exp %243 : vector<2x32xf32>
    %cst_72 = arith.constant 1.000000e+00 : f32
    %245 = vector.broadcast %cst_72 : f32 to vector<2x32xf32>
    %246 = arith.addf %245, %244 : vector<2x32xf32>
    %247 = arith.divf %245, %246 : vector<2x32xf32>
    %248 = arith.mulf %241, %210 : vector<2x32xf32>
    %249 = arith.mulf %236, %242 : vector<2x32xf32>
    %250 = arith.addf %248, %249 : vector<2x32xf32>
    %251 = math.tanh %250 : vector<2x32xf32>
    %252 = arith.mulf %247, %251 : vector<2x32xf32>
    %c6_i32 = arith.constant 6 : i32
    %253 = arith.index_cast %c6_i32 : i32 to index
    %c0_73 = arith.constant 0 : index
    %c0_74 = arith.constant 0 : index
    %c0_75 = arith.constant 0 : index
    %254 = vector.load %arg1[%253, %c0_73, %c0_74, %c0_75] : memref<8x4x2x32xf32, #tpu.memory_space<vmem>>, vector<1x4x2x32xf32>
    %255 = vector.shape_cast %254 : vector<1x4x2x32xf32> to vector<4x2x32xf32>
    %256 = vector.extract_strided_slice %255 {offsets = [0, 0, 0], sizes = [1, 2, 32], strides = [1, 1, 1]} : vector<4x2x32xf32> to vector<1x2x32xf32>
    %257 = vector.shape_cast %256 : vector<1x2x32xf32> to vector<2x32xf32>
    %cst_76 = arith.constant dense<0.000000e+00> : vector<2x32xf32>
    %258 = tpu.matmul %252, %4, %cst_76 {dimension_numbers = #tpu.dot_dimension_numbers<[1], [0], [0], [1], [0, 0, 1, 1], [], []>} : vector<2x32xf32>, vector<32x32xf32>, vector<2x32xf32> -> vector<2x32xf32>
    %259 = arith.addf %257, %258 : vector<2x32xf32>
    %260 = vector.extract_strided_slice %255 {offsets = [1, 0, 0], sizes = [1, 2, 32], strides = [1, 1, 1]} : vector<4x2x32xf32> to vector<1x2x32xf32>
    %261 = vector.shape_cast %260 : vector<1x2x32xf32> to vector<2x32xf32>
    %cst_77 = arith.constant dense<0.000000e+00> : vector<2x32xf32>
    %262 = tpu.matmul %252, %6, %cst_77 {dimension_numbers = #tpu.dot_dimension_numbers<[1], [0], [0], [1], [0, 0, 1, 1], [], []>} : vector<2x32xf32>, vector<32x32xf32>, vector<2x32xf32> -> vector<2x32xf32>
    %263 = arith.addf %261, %262 : vector<2x32xf32>
    %264 = vector.extract_strided_slice %255 {offsets = [2, 0, 0], sizes = [1, 2, 32], strides = [1, 1, 1]} : vector<4x2x32xf32> to vector<1x2x32xf32>
    %265 = vector.shape_cast %264 : vector<1x2x32xf32> to vector<2x32xf32>
    %cst_78 = arith.constant dense<0.000000e+00> : vector<2x32xf32>
    %266 = tpu.matmul %252, %8, %cst_78 {dimension_numbers = #tpu.dot_dimension_numbers<[1], [0], [0], [1], [0, 0, 1, 1], [], []>} : vector<2x32xf32>, vector<32x32xf32>, vector<2x32xf32> -> vector<2x32xf32>
    %267 = arith.addf %265, %266 : vector<2x32xf32>
    %268 = vector.extract_strided_slice %255 {offsets = [3, 0, 0], sizes = [1, 2, 32], strides = [1, 1, 1]} : vector<4x2x32xf32> to vector<1x2x32xf32>
    %269 = vector.shape_cast %268 : vector<1x2x32xf32> to vector<2x32xf32>
    %cst_79 = arith.constant dense<0.000000e+00> : vector<2x32xf32>
    %270 = tpu.matmul %252, %10, %cst_79 {dimension_numbers = #tpu.dot_dimension_numbers<[1], [0], [0], [1], [0, 0, 1, 1], [], []>} : vector<2x32xf32>, vector<32x32xf32>, vector<2x32xf32> -> vector<2x32xf32>
    %271 = arith.addf %269, %270 : vector<2x32xf32>
    %272 = arith.negf %259 : vector<2x32xf32>
    %273 = math.exp %272 : vector<2x32xf32>
    %cst_80 = arith.constant 1.000000e+00 : f32
    %274 = vector.broadcast %cst_80 : f32 to vector<2x32xf32>
    %275 = arith.addf %274, %273 : vector<2x32xf32>
    %276 = arith.divf %274, %275 : vector<2x32xf32>
    %277 = arith.negf %263 : vector<2x32xf32>
    %278 = math.exp %277 : vector<2x32xf32>
    %cst_81 = arith.constant 1.000000e+00 : f32
    %279 = vector.broadcast %cst_81 : f32 to vector<2x32xf32>
    %280 = arith.addf %279, %278 : vector<2x32xf32>
    %281 = arith.divf %279, %280 : vector<2x32xf32>
    %282 = math.tanh %267 : vector<2x32xf32>
    %283 = arith.negf %271 : vector<2x32xf32>
    %284 = math.exp %283 : vector<2x32xf32>
    %cst_82 = arith.constant 1.000000e+00 : f32
    %285 = vector.broadcast %cst_82 : f32 to vector<2x32xf32>
    %286 = arith.addf %285, %284 : vector<2x32xf32>
    %287 = arith.divf %285, %286 : vector<2x32xf32>
    %288 = arith.mulf %281, %250 : vector<2x32xf32>
    %289 = arith.mulf %276, %282 : vector<2x32xf32>
    %290 = arith.addf %288, %289 : vector<2x32xf32>
    %291 = math.tanh %290 : vector<2x32xf32>
    %292 = arith.mulf %287, %291 : vector<2x32xf32>
    %c7_i32 = arith.constant 7 : i32
    %293 = arith.index_cast %c7_i32 : i32 to index
    %c0_83 = arith.constant 0 : index
    %c0_84 = arith.constant 0 : index
    %c0_85 = arith.constant 0 : index
    %294 = vector.load %arg1[%293, %c0_83, %c0_84, %c0_85] : memref<8x4x2x32xf32, #tpu.memory_space<vmem>>, vector<1x4x2x32xf32>
    %295 = vector.shape_cast %294 : vector<1x4x2x32xf32> to vector<4x2x32xf32>
    %296 = vector.extract_strided_slice %295 {offsets = [0, 0, 0], sizes = [1, 2, 32], strides = [1, 1, 1]} : vector<4x2x32xf32> to vector<1x2x32xf32>
    %297 = vector.shape_cast %296 : vector<1x2x32xf32> to vector<2x32xf32>
    %cst_86 = arith.constant dense<0.000000e+00> : vector<2x32xf32>
    %298 = tpu.matmul %292, %4, %cst_86 {dimension_numbers = #tpu.dot_dimension_numbers<[1], [0], [0], [1], [0, 0, 1, 1], [], []>} : vector<2x32xf32>, vector<32x32xf32>, vector<2x32xf32> -> vector<2x32xf32>
    %299 = arith.addf %297, %298 : vector<2x32xf32>
    %300 = vector.extract_strided_slice %295 {offsets = [1, 0, 0], sizes = [1, 2, 32], strides = [1, 1, 1]} : vector<4x2x32xf32> to vector<1x2x32xf32>
    %301 = vector.shape_cast %300 : vector<1x2x32xf32> to vector<2x32xf32>
    %cst_87 = arith.constant dense<0.000000e+00> : vector<2x32xf32>
    %302 = tpu.matmul %292, %6, %cst_87 {dimension_numbers = #tpu.dot_dimension_numbers<[1], [0], [0], [1], [0, 0, 1, 1], [], []>} : vector<2x32xf32>, vector<32x32xf32>, vector<2x32xf32> -> vector<2x32xf32>
    %303 = arith.addf %301, %302 : vector<2x32xf32>
    %304 = vector.extract_strided_slice %295 {offsets = [2, 0, 0], sizes = [1, 2, 32], strides = [1, 1, 1]} : vector<4x2x32xf32> to vector<1x2x32xf32>
    %305 = vector.shape_cast %304 : vector<1x2x32xf32> to vector<2x32xf32>
    %cst_88 = arith.constant dense<0.000000e+00> : vector<2x32xf32>
    %306 = tpu.matmul %292, %8, %cst_88 {dimension_numbers = #tpu.dot_dimension_numbers<[1], [0], [0], [1], [0, 0, 1, 1], [], []>} : vector<2x32xf32>, vector<32x32xf32>, vector<2x32xf32> -> vector<2x32xf32>
    %307 = arith.addf %305, %306 : vector<2x32xf32>
    %308 = vector.extract_strided_slice %295 {offsets = [3, 0, 0], sizes = [1, 2, 32], strides = [1, 1, 1]} : vector<4x2x32xf32> to vector<1x2x32xf32>
    %309 = vector.shape_cast %308 : vector<1x2x32xf32> to vector<2x32xf32>
    %cst_89 = arith.constant dense<0.000000e+00> : vector<2x32xf32>
    %310 = tpu.matmul %292, %10, %cst_89 {dimension_numbers = #tpu.dot_dimension_numbers<[1], [0], [0], [1], [0, 0, 1, 1], [], []>} : vector<2x32xf32>, vector<32x32xf32>, vector<2x32xf32> -> vector<2x32xf32>
    %311 = arith.addf %309, %310 : vector<2x32xf32>
    %312 = arith.negf %299 : vector<2x32xf32>
    %313 = math.exp %312 : vector<2x32xf32>
    %cst_90 = arith.constant 1.000000e+00 : f32
    %314 = vector.broadcast %cst_90 : f32 to vector<2x32xf32>
    %315 = arith.addf %314, %313 : vector<2x32xf32>
    %316 = arith.divf %314, %315 : vector<2x32xf32>
    %317 = arith.negf %303 : vector<2x32xf32>
    %318 = math.exp %317 : vector<2x32xf32>
    %cst_91 = arith.constant 1.000000e+00 : f32
    %319 = vector.broadcast %cst_91 : f32 to vector<2x32xf32>
    %320 = arith.addf %319, %318 : vector<2x32xf32>
    %321 = arith.divf %319, %320 : vector<2x32xf32>
    %322 = math.tanh %307 : vector<2x32xf32>
    %323 = arith.negf %311 : vector<2x32xf32>
    %324 = math.exp %323 : vector<2x32xf32>
    %cst_92 = arith.constant 1.000000e+00 : f32
    %325 = vector.broadcast %cst_92 : f32 to vector<2x32xf32>
    %326 = arith.addf %325, %324 : vector<2x32xf32>
    %327 = arith.divf %325, %326 : vector<2x32xf32>
    %328 = arith.mulf %321, %290 : vector<2x32xf32>
    %329 = arith.mulf %316, %322 : vector<2x32xf32>
    %330 = arith.addf %328, %329 : vector<2x32xf32>
    %331 = math.tanh %330 : vector<2x32xf32>
    %332 = arith.mulf %327, %331 : vector<2x32xf32>
    %c8_i32 = arith.constant 8 : i32
    %c0_93 = arith.constant 0 : index
    %c0_94 = arith.constant 0 : index
    %333 = vector.load %arg8[%c0_93, %c0_94] : memref<2x32xf32, #tpu.memory_space<vmem>>, vector<2x32xf32>
    tpu.vector_store %arg8[%c0_93, %c0_94], %332 {strides = array<i32>} : memref<2x32xf32, #tpu.memory_space<vmem>>, vector<2x32xf32>,
    %c0_95 = arith.constant 0 : index
    %c0_96 = arith.constant 0 : index
    %334 = vector.load %arg9[%c0_95, %c0_96] : memref<2x32xf32, #tpu.memory_space<vmem>>, vector<2x32xf32>
    tpu.vector_store %arg9[%c0_95, %c0_96], %330 {strides = array<i32>} : memref<2x32xf32, #tpu.memory_space<vmem>>, vector<2x32xf32>,
    %c0_i32_97 = arith.constant 0 : i32
    %335 = arith.cmpi eq, %arg0, %c0_i32_97 : i32
    %336 = arith.extui %335 : i1 to i32
    %c0_i32_98 = arith.constant 0 : i32
    %337 = arith.cmpi ne, %336, %c0_i32_98 : i32
    scf.if %337 {
      %cst_99 = arith.constant dense<0.000000e+00> : vector<32xf32>
      %338 = vector.multi_reduction <add>, %332, %cst_99 [0] : vector<2x32xf32> to vector<32xf32>
      %339 = vector.shape_cast %338 : vector<32xf32> to vector<1x32xf32>
      %cst_100 = arith.constant 2.000000e+00 : f32
      %340 = vector.broadcast %cst_100 : f32 to vector<1x32xf32>
      %341 = arith.divf %339, %340 : vector<1x32xf32>
      %342 = vector.broadcast %341 : vector<1x32xf32> to vector<2x32xf32>
      %343 = arith.subf %332, %342 : vector<2x32xf32>
      %344 = arith.mulf %343, %343 : vector<2x32xf32>
      %cst_101 = arith.constant dense<0.000000e+00> : vector<32xf32>
      %345 = vector.multi_reduction <add>, %344, %cst_101 [0] : vector<2x32xf32> to vector<32xf32>
      %346 = vector.shape_cast %345 : vector<32xf32> to vector<1x32xf32>
      %cst_102 = arith.constant 2.000000e+00 : f32
      %347 = vector.broadcast %cst_102 : f32 to vector<1x32xf32>
      %348 = arith.divf %346, %347 : vector<1x32xf32>
      %349 = vector.broadcast %341 : vector<1x32xf32> to vector<2x32xf32>
      %350 = arith.subf %332, %349 : vector<2x32xf32>
      %cst_103 = arith.constant 9.99999974E-6 : f32
      %351 = vector.broadcast %cst_103 : f32 to vector<1x32xf32>
      %352 = arith.addf %348, %351 : vector<1x32xf32>
      %353 = math.rsqrt %352 : vector<1x32xf32>
      %354 = vector.broadcast %353 : vector<1x32xf32> to vector<2x32xf32>
      %355 = arith.mulf %350, %354 : vector<2x32xf32>
      %c0_104 = arith.constant 0 : index
      %c0_105 = arith.constant 0 : index
      %356 = vector.load %arg3[%c0_104, %c0_105] : memref<1x32xf32, #tpu.memory_space<vmem>>, vector<1x32xf32>
      %357 = vector.broadcast %356 : vector<1x32xf32> to vector<2x32xf32>
      %358 = arith.mulf %355, %357 : vector<2x32xf32>
      %c0_106 = arith.constant 0 : index
      %c0_107 = arith.constant 0 : index
      %359 = vector.load %arg4[%c0_106, %c0_107] : memref<1x32xf32, #tpu.memory_space<vmem>>, vector<1x32xf32>
      %360 = vector.broadcast %359 : vector<1x32xf32> to vector<2x32xf32>
      %361 = arith.addf %358, %360 : vector<2x32xf32>
      %c0_108 = arith.constant 0 : index
      %c0_109 = arith.constant 0 : index
      %362 = vector.load %arg5[%c0_108, %c0_109] : memref<32x8xf32, #tpu.memory_space<vmem>>, vector<32x8xf32>
      %cst_110 = arith.constant dense<0.000000e+00> : vector<2x8xf32>
      %363 = tpu.matmul %361, %362, %cst_110 {dimension_numbers = #tpu.dot_dimension_numbers<[1], [0], [0], [1], [0, 0, 1, 1], [], []>} : vector<2x32xf32>, vector<32x8xf32>, vector<2x8xf32> -> vector<2x8xf32>
      %c0_111 = arith.constant 0 : index
      %c0_112 = arith.constant 0 : index
      %364 = vector.load %arg6[%c0_111, %c0_112] : memref<1x8xf32, #tpu.memory_space<vmem>>, vector<1x8xf32>
      %365 = vector.broadcast %364 : vector<1x8xf32> to vector<2x8xf32>
      %366 = arith.addf %363, %365 : vector<2x8xf32>
      %c0_113 = arith.constant 0 : index
      %c0_114 = arith.constant 0 : index
      %367 = vector.load %arg7[%c0_113, %c0_114] : memref<2x8xf32, #tpu.memory_space<vmem>>, vector<2x8xf32>
      tpu.vector_store %arg7[%c0_113, %c0_114], %366 {strides = array<i32>} : memref<2x8xf32, #tpu.memory_space<vmem>>, vector<2x8xf32>,
    } else {
    }
    return
  }
  func.func @transform_0(%arg0: i32) -> (i32, i32, i32, i32) {
    %c0_i32 = arith.constant 0 : i32
    %c0_i32_0 = arith.constant 0 : i32
    %c0_i32_1 = arith.constant 0 : i32
    %c0_i32_2 = arith.constant 0 : i32
    return %arg0, %c0_i32, %c0_i32_0, %c0_i32_1 : i32, i32, i32, i32
  }
  func.func @transform_1(%arg0: i32) -> (i32, i32, i32) {
    %c0_i32 = arith.constant 0 : i32
    %c0_i32_0 = arith.constant 0 : i32
    %c0_i32_1 = arith.constant 0 : i32
    %c0_i32_2 = arith.constant 0 : i32
    return %c0_i32, %c0_i32_0, %c0_i32_1 : i32, i32, i32
  }
  func.func @transform_2(%arg0: i32) -> (i32, i32) {
    %c0_i32 = arith.constant 0 : i32
    %c0_i32_0 = arith.constant 0 : i32
    %c0_i32_1 = arith.constant 0 : i32
    return %c0_i32, %c0_i32_0 : i32, i32
  }
  func.func @transform_3(%arg0: i32) -> (i32, i32) {
    %c0_i32 = arith.constant 0 : i32
    %c0_i32_0 = arith.constant 0 : i32
    %c0_i32_1 = arith.constant 0 : i32
    return %c0_i32, %c0_i32_0 : i32, i32
  }
  func.func @transform_4(%arg0: i32) -> (i32, i32) {
    %c0_i32 = arith.constant 0 : i32
    %c0_i32_0 = arith.constant 0 : i32
    %c0_i32_1 = arith.constant 0 : i32
    return %c0_i32, %c0_i32_0 : i32, i32
  }
  func.func @transform_5(%arg0: i32) -> (i32, i32) {
    %c0_i32 = arith.constant 0 : i32
    %c0_i32_0 = arith.constant 0 : i32
    %c0_i32_1 = arith.constant 0 : i32
    return %c0_i32, %c0_i32_0 : i32, i32
  }
  func.func @transform_6(%arg0: i32) -> (i32, i32) {
    %c0_i32 = arith.constant 0 : i32
    %c0_i32_0 = arith.constant 0 : i32
    %c0_i32_1 = arith.constant 0 : i32
    return %c0_i32, %c0_i32_0 : i32, i32
  }
}

</mosaic_0001>

<bundles_post_ra>
// kernel: tpu_custom_call.1
= control target key start
LH: loop header
LB: loop body
LE: loop exit
PB: predicated region body
PF: predicated region fallthrough
CT: control target
= control target key end

     0   :  { %11 = vsyncpa [#allocation5], 0  ;;  %s4135_s0 = inlined_call_operand.hbm [shape: f32[8,4,2,32], index: 0, kind: input, shape index: {}]   ;;  %s4136_s1 = inlined_call_operand.hbm [shape: f32[4,32,32], index: 1, kind: input, shape index: {}]   ;;  %s4137_s2 = inlined_call_operand.vmem [shape: f32[1,32], index: 2, kind: input, shape index: {}]   ;;  %s4138_s3 = inlined_call_operand.vmem [shape: f32[1,32], index: 3, kind: input, shape index: {}]   ;;  %s4139_s4 = inlined_call_operand.vmem [shape: f32[32,8], index: 4, kind: input, shape index: {}]   ;;  %s4140_s5 = inlined_call_operand.vmem [shape: f32[1,8], index: 5, kind: input, shape index: {}]   ;;  %s4141_s6 = inlined_call_operand.hbm [shape: f32[2,8], index: 6, kind: output, shape index: {}]  }
   0x1   :  { %12 = vsyncpa [#allocation8], 0 }
   0x2   :  { %13 = vsyncpa [#allocation6], 0  ;;  %s3752_s21 = smov [#allocation4]   ;;  %s3680_s25 = scalar_lea.hbm %s4135_s0, 1024 }
   0x3   :  { %s19_s22 = sshll.u32 %s3752_s21, 4  ;;  %p3681_p0 = scmp.ne.s32.totalorder %s4135_s0, %s3680_s25  ;;  %s20_s22 = int_to_ptr.vmem [resolvable:$true] %s19_s22 }
   0x4   :  { %p3684_p1 = scmp.lt.u32.totalorder %s3680_s25, %s4135_s0 }
   0x6   :  { %p3686_p2 = pnand %p3684_p1, %p3681_p0 }
   0x8   :  { %3689 = shalt.err (!%p3686_p2)
}
   0x9   :  { %s3690_s30 = scalar_lea.vmem %s20_s22, 1024  ;;  %p3695_p4 = scmp.lt.s32.totalorder %s20_s22, %s20_s22 }
   0xa   :  { %p3691_p3 = scmp.ne.s32.totalorder %s20_s22, %s3690_s30  ;;  %p3696_p5 = scmp.lt.s32.totalorder %s3690_s30, %s3690_s30 }
   0xc   :  { %p3697_p6 = por %p3696_p5, %p3695_p4 }
   0xe   :  { %p3698_p7 = pnand %p3697_p6, %p3691_p3 }
  0x10   :  { %3701 = shalt.err (!%p3698_p7)
}
  0x11   :  { %s3753_s7 = smov 32   ;;  %s3754_s8 = smov 2  }
  0x12   :  { %25 = dma.hbm_to_vmem [thread:$0]  %s4135_s0, 1024, %s20_s22, [#allocation5], %s3753_s7, %s3753_s7, %s3754_s8  }
  0x13   :  { %s3755_s11 = smov [#allocation7]   ;;  %s3702_s15 = scalar_lea.hbm %s4136_s1, 2048 }
  0x14   :  { %s31_s12 = sshll.u32 %s3755_s11, 4  ;;  %p3703_p8 = scmp.ne.s32.totalorder %s4136_s1, %s3702_s15  ;;  %s32_s12 = int_to_ptr.vmem [resolvable:$true] %s31_s12 }
  0x15   :  { %p3706_p9 = scmp.lt.u32.totalorder %s3702_s15, %s4136_s1 }
  0x17   :  { %p3708_p10 = pnand %p3706_p9, %p3703_p8 }
  0x19   :  { %3711 = shalt.err (!%p3708_p10)
}
  0x1a   :  { %s3712_s20 = scalar_lea.vmem %s32_s12, 2048  ;;  %p3717_p12 = scmp.lt.s32.totalorder %s32_s12, %s32_s12 }
  0x1b   :  { %p3713_p11 = scmp.ne.s32.totalorder %s32_s12, %s3712_s20  ;;  %p3718_p13 = scmp.lt.s32.totalorder %s3712_s20, %s3712_s20 }
  0x1d   :  { %p3719_p0 = por %p3718_p13, %p3717_p12 }
  0x1f   :  { %p3720_p1 = pnand %p3719_p0, %p3713_p11 }
  0x21   :  { %3723 = shalt.err (!%p3720_p1)
}
  0x22   :  { %s3756_s0 = smov 128   ;;  %s3757_s21 = smov 8  }
  0x23   :  { %37 = dma.hbm_to_vmem [thread:$0]  %s4136_s1, 2048, %s32_s12, [#allocation8], %s3756_s0, %s3756_s0, %s3757_s21  }
  0x24   :  { %3746 = dma.done.wait [#allocation5], 1024  }
  0x25   :  { %3747 = vsyncadd [#allocation5], 4294966272 }
  0x26   :  { %3748 = dma.done.wait [#allocation8], 2048  }
  0x27   :  { %3749 = vsyncadd [#allocation8], 4294965248  ;;  %vm56_vm0 = vcmask 254976   ;;  %v3758_v0 = vmov 0.0|0.0   ;;  %v3759_v1 = vmov 0.0   ;;  %vm3760_vm1 = vmmov 0  }
  0x28   :  { %3342 = vmatprep.subr.bf16.mxu0 %v3758_v0  ;;  %3348 = vmatprep.subr.bf16.mxu1 %v3758_v0  ;;  %57 = vst.msk [vmem:[#allocation2] sm:$0x3] %vm56_vm0, %v3759_v1  ;;  %58 = vst.msk [vmem:[#allocation3] sm:$0x3] %vm56_vm0, %v3759_v1  ;;  %v59_v2 = vld [vmem:[#allocation7] sm:$0xff]  ;;  %v60_v3 = vld [vmem:[#allocation7 + $0x8] sm:$0xff] }
  0x29   :  { %2987 = vmatprep.mubr.msk.f32.mxu0 %vm3760_vm1, %v3759_v1  ;;  %2998 = vmatprep.mubr.msk.f32.mxu1 %vm3760_vm1, %v3759_v1  ;;  %v64_v4 = vld [vmem:[#allocation7 + $0x20] sm:$0xff]  ;;  %v3831_v5 = vpack.c.bf16 %v60_v3, %v59_v2  ;;  %v65_v6 = vld [vmem:[#allocation7 + $0x28] sm:$0xff]  ;;  %v61_v7 = vld [vmem:[#allocation7 + $0x10] sm:$0xff]  ;;  %vm84_vm2 = vcmask 261120   ;;  %s3761_s12 = smov [#allocation9]   ;;  %vm2736_vm3 = vcmask 58368  }
  0x2a   :  { %v62_v8 = vld [vmem:[#allocation7 + $0x18] sm:$0xff]  ;;  %v3833_v9 = vpack.c.bf16 %v65_v6, %v64_v4  ;;  %v66_v10 = vld [vmem:[#allocation7 + $0x30] sm:$0xff]  ;;  %v69_v14 = vld [vmem:[#allocation7 + $0x40] sm:$0xff]  ;;  %s2744_s13 = sshll.u32 %s3761_s12, 4  ;;  %s2745_s13 = int_to_ptr.vmem [resolvable:$true] %s2744_s13 }
  0x2b   :  { %v67_v11 = vld [vmem:[#allocation7 + $0x38] sm:$0xff]  ;;  %3344 = vmatpush3.bf16.msra.mxu0 %v3831_v5  ;;  %v3836_v12 = vpack.c.bf16 %v62_v8, %v61_v7  ;;  %v70_v15 = vld [vmem:[#allocation7 + $0x48] sm:$0xff]  ;;  %v74_v16 = vld [vmem:[#allocation7 + $0x60] sm:$0xff]  ;;  %p3729_p3 = scmp.lt.s32.totalorder %s2745_s13, %s2745_s13 }
  0x2c   :  { %3350 = vmatpush3.bf16.msra.mxu1 %v3833_v9  ;;  %3345 = vmatprep.subr.bf16.mxu0 %v3758_v0  ;;  %v3840_v13 = vpack.c.bf16 %v67_v11, %v66_v10  ;;  %v75_v17 = vld [vmem:[#allocation7 + $0x68] sm:$0xff]  ;;  %v3844_v19 = vpack.c.bf16 %v70_v15, %v69_v14  ;;  %v71_v21 = vld [vmem:[#allocation7 + $0x50] sm:$0xff]  ;;  %v72_v22 = vld [vmem:[#allocation7 + $0x58] sm:$0xff] }
  0x2d   :  { %3351 = vmatprep.subr.bf16.mxu1 %v3758_v0  ;;  %v3848_v20 = vpack.c.bf16 %v75_v17, %v74_v16  ;;  %v76_v23 = vld [vmem:[#allocation7 + $0x70] sm:$0xff]  ;;  %v77_v24 = vld [vmem:[#allocation7 + $0x78] sm:$0xff]  ;;  %v3854_v25 = vpack.c.bf16 %v72_v22, %v71_v21  ;;  %v80_v27 = vld [vmem:[#allocation4] sm:$0x3] }
  0x2e   :  { %v3858_v26 = vpack.c.bf16 %v77_v24, %v76_v23  ;;  %v81_v28 = vld [vmem:[#allocation4 + $0x2] sm:$0x3]  ;;  %v83_v37 = vld [vmem:[#allocation4 + $0x6] sm:$0x3]  ;;  %v82_v39 = vld [vmem:[#allocation4 + $0x4] sm:$0x3] }
  0x2f   :  { %3347 = vmatpush3.bf16.msra.mxu0 %v3836_v12  ;;  %v78_v18 = vld [vmem:[#allocation2] sm:$0x3]  ;;  %v79_v52 = vld [vmem:[#allocation3] sm:$0x3]  ;;  %v397_v62 = vld [vmem:[#allocation4 + $0x8] sm:$0x3] }
  0x30   :  { %3353 = vmatpush3.bf16.msra.mxu1 %v3840_v13  ;;  %3354 = vmatprep.subr.bf16.mxu0 %v3758_v0  ;;  %v398_v63 = vld [vmem:[#allocation4 + $0xa] sm:$0x3]  ;;  %v400_v14 = vld [vmem:[#allocation4 + $0xe] sm:$0x3]  ;;  %v399_v22 = vld [vmem:[#allocation4 + $0xc] sm:$0x3] }
  0x31   :  { %3360 = vmatprep.subr.bf16.mxu1 %v3758_v0 }
  0x32   :  { %2988 = vmatmul.mubr.msk.f32.vlgmr.msra.gmra.mrb[0].mxu0 %vm84_vm2, %v78_v18 }
  0x33   :  { %2999 = vmatmul.mubr.msk.f32.vlgmr.msra.gmra.mrb[0].mxu1 %vm84_vm2, %v78_v18  ;;  %3356 = vmatpush3.bf16.msra.mxu0 %v3844_v19 }
  0x34   :  { %3362 = vmatpush3.bf16.msra.mxu1 %v3848_v20  ;;  %3357 = vmatprep.subr.bf16.mxu0 %v3758_v0 }
  0x35   :  { %3363 = vmatprep.subr.bf16.mxu1 %v3758_v0  ;;  %3009 = vmatprep.mubr.msk.f32.mxu0 %vm3760_vm1, %v3759_v1 }
  0x36   :  { %3020 = vmatprep.mubr.msk.f32.mxu1 %vm3760_vm1, %v3759_v1 }
  0x37   :  { %3359 = vmatpush3.bf16.msra.mxu0 %v3854_v25 }
  0x38   :  { %3365 = vmatpush3.bf16.msra.mxu1 %v3858_v26  ;;  %3366 = vmatprep.subr.bf16.mxu0 %v3758_v0 }
  0x39   :  { %3372 = vmatprep.subr.bf16.mxu1 %v3758_v0 }
  0x3a   :  { %3010 = vmatmul.mubr.msk.f32.vlgmr.msra.gmra.mrb[2].mxu0 %vm84_vm2, %v78_v18 }
  0x3b   :  { %3021 = vmatmul.mubr.msk.f32.vlgmr.msra.gmra.mrb[2].mxu1 %vm84_vm2, %v78_v18  ;;  %3368 = vmatpush3.bf16.msra.mxu0 %v3831_v5 }
  0x3c   :  { %3374 = vmatpush3.bf16.msra.mxu1 %v3833_v9  ;;  %3369 = vmatprep.subr.bf16.mxu0 %v3758_v0 }
  0x3d   :  { %3375 = vmatprep.subr.bf16.mxu1 %v3758_v0  ;;  %3031 = vmatprep.mubr.msk.f32.mxu0 %vm3760_vm1, %v3759_v1 }
  0x3e   :  { %3042 = vmatprep.mubr.msk.f32.mxu1 %vm3760_vm1, %v3759_v1 }
  0x3f   :  { %3371 = vmatpush3.bf16.msra.mxu0 %v3836_v12 }
  0x40   :  { %3377 = vmatpush3.bf16.msra.mxu1 %v3840_v13  ;;  %3378 = vmatprep.subr.bf16.mxu0 %v3758_v0 }
  0x41   :  { %3384 = vmatprep.subr.bf16.mxu1 %v3758_v0 }
 0x105   :  { %v154_v29 = vpop.f32.mrb[0].mxu0 }
 0x106   :  { %v158_v30 = vadd.f32 %v154_v29, %v80_v27  ;;  %v225_v31 = vpop.f32.mrb[0].mxu1  ;;  %v2989_v32 = vpop.f32.mrb[1].mxu0 }
 0x107   :  { %v229_v33 = vadd.f32 %v225_v31, %v81_v28  ;;  %v3000_v34 = vpop.f32.mrb[1].mxu1 }
 0x108   :  { %v2758_v35 = vmul.f32 -1.442695, %v158_v30 }
 0x109   :  { %v2759_v36 = vmul.f32 -1.442695, %v229_v33 }
 0x10a   :  { %3550 = vpow2.f32 %v2758_v35 }
 0x10b   :  { %3552 = vpow2.f32 %v2759_v36 }
 0x10d   :  { %v296_v38 = vpop.f32.mrb[2].mxu0 }
 0x10e   :  { %v367_v40 = vpop.f32.mrb[2].mxu1  ;;  %v3011_v41 = vpop.f32.mrb[3].mxu0  ;;  %v300_v44 = vadd.f32 %v296_v38, %v82_v39 }
 0x10f   :  { %v371_v42 = vadd.f32 %v367_v40, %v83_v37  ;;  %v3022_v43 = vpop.f32.mrb[3].mxu1 }
 0x110   :  { %v714_v43 = vld [vmem:[#allocation4 + $0x12] sm:$0x3] }
 0x111   :  { %v2760_v45 = vmul.f32 -1.442695, %v371_v42  ;;  %v713_v42 = vld [vmem:[#allocation4 + $0x10] sm:$0x3] }
 0x113   :  { %3554 = vpow2.f32 %v2760_v45 }
 0x114   :  { %v3551_v46 = vpop.eup %3550  ;;  %3556 = vtanh.f32 %v300_v44 }
 0x115   :  { %v3553_v47 = vpop.eup %3552  ;;  %v375_v48 = vadd.f32 1.0, %v3551_v46 }
 0x116   :  { %v381_v49 = vadd.f32 1.0, %v3553_v47 }
 0x117   :  { %3558 = vrcp.f32 %v375_v48 }
 0x118   :  { %3560 = vrcp.f32 %v381_v49 }
 0x11d   :  { %v3555_v50 = vpop.eup %3554 }
 0x11e   :  { %v3557_v51 = vpop.eup %3556  ;;  %v388_v54 = vadd.f32 1.0, %v3555_v50 }
 0x120   :  { %3562 = vrcp.f32 %v388_v54 }
 0x121   :  { %v3559_v53 = vpop.eup %3558 }
 0x122   :  { %v3561_v55 = vpop.eup %3560  ;;  %v392_v56 = vmul.f32 %v3559_v53, %v3557_v51 }
 0x123   :  { %v391_v57 = vmul.f32 %v3561_v55, %v79_v52  ;;  %v716_v52 = vld [vmem:[#allocation4 + $0x16] sm:$0x3] }
 0x125   :  { %v3883_v58 = vadd.f32 %v392_v56, %v391_v57 }
 0x127   :  { %3564 = vtanh.f32 %v3883_v58 }
 0x12a   :  { %v3563_v59 = vpop.eup %3562 }
 0x131   :  { %v3565_v60 = vpop.eup %3564 }
 0x132   :  { %v395_v61 = vmul.f32 %v3565_v60, %v3563_v59 }
 0x134   :  { %3032 = vmatmul.mubr.msk.f32.vlgmr.msra.gmra.mrb[4].mxu0 %vm84_vm2, %v395_v61  ;;  %3043 = vmatmul.mubr.msk.f32.vlgmr.msra.gmra.mrb[4].mxu1 %vm84_vm2, %v395_v61 }
 0x135   :  { %3380 = vmatpush3.bf16.msra.mxu0 %v3844_v19  ;;  %3386 = vmatpush3.bf16.msra.mxu1 %v3848_v20 }
 0x136   :  { %3381 = vmatprep.subr.bf16.mxu0 %v3758_v0  ;;  %3387 = vmatprep.subr.bf16.mxu1 %v3758_v0 }
 0x137   :  { %3053 = vmatprep.mubr.msk.f32.mxu0 %vm3760_vm1, %v3759_v1  ;;  %3064 = vmatprep.mubr.msk.f32.mxu1 %vm3760_vm1, %v3759_v1 }
 0x139   :  { %3383 = vmatpush3.bf16.msra.mxu0 %v3854_v25  ;;  %3389 = vmatpush3.bf16.msra.mxu1 %v3858_v26 }
 0x13a   :  { %3390 = vmatprep.subr.bf16.mxu0 %v3758_v0  ;;  %3396 = vmatprep.subr.bf16.mxu1 %v3758_v0 }
 0x13c   :  { %3054 = vmatmul.mubr.msk.f32.vlgmr.msra.gmra.mrb[6].mxu0 %vm84_vm2, %v395_v61  ;;  %3065 = vmatmul.mubr.msk.f32.vlgmr.msra.gmra.mrb[6].mxu1 %vm84_vm2, %v395_v61 }
 0x13d   :  { %3392 = vmatpush3.bf16.msra.mxu0 %v3831_v5  ;;  %3398 = vmatpush3.bf16.msra.mxu1 %v3833_v9 }
 0x13e   :  { %3393 = vmatprep.subr.bf16.mxu0 %v3758_v0  ;;  %3399 = vmatprep.subr.bf16.mxu1 %v3758_v0 }
 0x13f   :  { %3075 = vmatprep.mubr.msk.f32.mxu0 %vm3760_vm1, %v3759_v1  ;;  %3086 = vmatprep.mubr.msk.f32.mxu1 %vm3760_vm1, %v3759_v1 }
 0x141   :  { %3395 = vmatpush3.bf16.msra.mxu0 %v3836_v12  ;;  %3401 = vmatpush3.bf16.msra.mxu1 %v3840_v13 }
 0x142   :  { %3402 = vmatprep.subr.bf16.mxu0 %v3758_v0  ;;  %3408 = vmatprep.subr.bf16.mxu1 %v3758_v0 }
 0x207   :  { %v470_v2 = vpop.f32.mrb[4].mxu0  ;;  %v541_v3 = vpop.f32.mrb[4].mxu1 }
 0x208   :  { %v474_v4 = vadd.f32 %v470_v2, %v397_v62  ;;  %v545_v6 = vadd.f32 %v541_v3, %v398_v63  ;;  %v3033_v7 = vpop.f32.mrb[5].mxu0  ;;  %v3044_v8 = vpop.f32.mrb[5].mxu1 }
 0x20a   :  { %v2765_v10 = vmul.f32 -1.442695, %v474_v4  ;;  %v2766_v11 = vmul.f32 -1.442695, %v545_v6 }
 0x20c   :  { %3566 = vpow2.f32 %v2765_v10 }
 0x20d   :  { %3568 = vpow2.f32 %v2766_v11 }
 0x20f   :  { %v612_v15 = vpop.f32.mrb[6].mxu0  ;;  %v683_v16 = vpop.f32.mrb[6].mxu1 }
 0x210   :  { %v687_v17 = vadd.f32 %v683_v16, %v400_v14  ;;  %v3055_v18 = vpop.f32.mrb[7].mxu0  ;;  %v3066_v21 = vpop.f32.mrb[7].mxu1  ;;  %v616_v24 = vadd.f32 %v612_v15, %v399_v22 }
 0x211   :  { %v1029_v18 = vld [vmem:[#allocation4 + $0x18] sm:$0x3]  ;;  %v1030_v21 = vld [vmem:[#allocation4 + $0x1a] sm:$0x3] }
 0x212   :  { %v2767_v23 = vmul.f32 -1.442695, %v687_v17 }
 0x214   :  { %3570 = vpow2.f32 %v2767_v23 }
 0x215   :  { %3572 = vtanh.f32 %v616_v24 }
 0x216   :  { %v3567_v27 = vpop.eup %3566 }
 0x217   :  { %v3569_v28 = vpop.eup %3568  ;;  %v691_v29 = vadd.f32 1.0, %v3567_v27 }
 0x218   :  { %v697_v30 = vadd.f32 1.0, %v3569_v28 }
 0x219   :  { %3574 = vrcp.f32 %v691_v29 }
 0x21a   :  { %3576 = vrcp.f32 %v697_v30 }
 0x21e   :  { %v3571_v31 = vpop.eup %3570 }
 0x21f   :  { %v3573_v32 = vpop.eup %3572  ;;  %v704_v36 = vadd.f32 1.0, %v3571_v31 }
 0x221   :  { %3578 = vrcp.f32 %v704_v36 }
 0x223   :  { %v3575_v33 = vpop.eup %3574 }
 0x224   :  { %v3577_v34 = vpop.eup %3576  ;;  %v708_v35 = vmul.f32 %v3575_v33, %v3573_v32  ;;  %v1032_v32 = vld [vmem:[#allocation4 + $0x1e] sm:$0x3] }
 0x225   :  { %v707_v37 = vmul.f32 %v3577_v34, %v3883_v58  ;;  %v715_v58 = vld [vmem:[#allocation4 + $0x14] sm:$0x3] }
 0x227   :  { %v3915_v38 = vadd.f32 %v708_v35, %v707_v37 }
 0x229   :  { %3580 = vtanh.f32 %v3915_v38 }
 0x22b   :  { %v3579_v39 = vpop.eup %3578 }
 0x233   :  { %v3581_v40 = vpop.eup %3580 }
 0x234   :  { %v711_v41 = vmul.f32 %v3581_v40, %v3579_v39 }
 0x236   :  { %3076 = vmatmul.mubr.msk.f32.vlgmr.msra.gmra.mrb[8].mxu0 %vm84_vm2, %v711_v41  ;;  %3087 = vmatmul.mubr.msk.f32.vlgmr.msra.gmra.mrb[8].mxu1 %vm84_vm2, %v711_v41 }
 0x237   :  { %3404 = vmatpush3.bf16.msra.mxu0 %v3844_v19  ;;  %3410 = vmatpush3.bf16.msra.mxu1 %v3848_v20 }
 0x238   :  { %3405 = vmatprep.subr.bf16.mxu0 %v3758_v0  ;;  %3411 = vmatprep.subr.bf16.mxu1 %v3758_v0 }
 0x239   :  { %3097 = vmatprep.mubr.msk.f32.mxu0 %vm3760_vm1, %v3759_v1  ;;  %3108 = vmatprep.mubr.msk.f32.mxu1 %vm3760_vm1, %v3759_v1 }
 0x23b   :  { %3407 = vmatpush3.bf16.msra.mxu0 %v3854_v25  ;;  %3413 = vmatpush3.bf16.msra.mxu1 %v3858_v26 }
 0x23c   :  { %3414 = vmatprep.subr.bf16.mxu0 %v3758_v0  ;;  %3420 = vmatprep.subr.bf16.mxu1 %v3758_v0 }
 0x23e   :  { %3098 = vmatmul.mubr.msk.f32.vlgmr.msra.gmra.mrb[10].mxu0 %vm84_vm2, %v711_v41  ;;  %3109 = vmatmul.mubr.msk.f32.vlgmr.msra.gmra.mrb[10].mxu1 %vm84_vm2, %v711_v41 }
 0x23f   :  { %3416 = vmatpush3.bf16.msra.mxu0 %v3831_v5  ;;  %3422 = vmatpush3.bf16.msra.mxu1 %v3833_v9 }
 0x240   :  { %3417 = vmatprep.subr.bf16.mxu0 %v3758_v0  ;;  %3423 = vmatprep.subr.bf16.mxu1 %v3758_v0 }
 0x241   :  { %3119 = vmatprep.mubr.msk.f32.mxu0 %vm3760_vm1, %v3759_v1  ;;  %3130 = vmatprep.mubr.msk.f32.mxu1 %vm3760_vm1, %v3759_v1 }
 0x243   :  { %3419 = vmatpush3.bf16.msra.mxu0 %v3836_v12  ;;  %3425 = vmatpush3.bf16.msra.mxu1 %v3840_v13 }
 0x244   :  { %3426 = vmatprep.subr.bf16.mxu0 %v3758_v0  ;;  %3432 = vmatprep.subr.bf16.mxu1 %v3758_v0 }
 0x309   :  { %v786_v44 = vpop.f32.mrb[8].mxu0  ;;  %v857_v45 = vpop.f32.mrb[8].mxu1 }
 0x30a   :  { %v790_v46 = vadd.f32 %v786_v44, %v713_v42  ;;  %v861_v47 = vadd.f32 %v857_v45, %v714_v43  ;;  %v3077_v48 = vpop.f32.mrb[9].mxu0  ;;  %v3088_v49 = vpop.f32.mrb[9].mxu1 }
 0x30c   :  { %v2772_v50 = vmul.f32 -1.442695, %v790_v46  ;;  %v2773_v51 = vmul.f32 -1.442695, %v861_v47 }
 0x30e   :  { %3582 = vpow2.f32 %v2772_v50 }
 0x30f   :  { %3584 = vpow2.f32 %v2773_v51 }
 0x311   :  { %v928_v53 = vpop.f32.mrb[10].mxu0  ;;  %v999_v54 = vpop.f32.mrb[10].mxu1 }
 0x312   :  { %v1003_v55 = vadd.f32 %v999_v54, %v716_v52  ;;  %v3099_v56 = vpop.f32.mrb[11].mxu0  ;;  %v3110_v57 = vpop.f32.mrb[11].mxu1  ;;  %v932_v60 = vadd.f32 %v928_v53, %v715_v58 }
 0x313   :  { %v1345_v56 = vld [vmem:[#allocation4 + $0x20] sm:$0x3]  ;;  %v1346_v57 = vld [vmem:[#allocation4 + $0x22] sm:$0x3] }
 0x314   :  { %v2774_v59 = vmul.f32 -1.442695, %v1003_v55 }
 0x316   :  { %3586 = vpow2.f32 %v2774_v59 }
 0x317   :  { %3588 = vtanh.f32 %v932_v60 }
 0x318   :  { %v3583_v61 = vpop.eup %3582 }
 0x319   :  { %v3585_v62 = vpop.eup %3584  ;;  %v1007_v63 = vadd.f32 1.0, %v3583_v61 }
 0x31a   :  { %v1013_v2 = vadd.f32 1.0, %v3585_v62 }
 0x31b   :  { %3590 = vrcp.f32 %v1007_v63 }
 0x31c   :  { %3592 = vrcp.f32 %v1013_v2 }
 0x320   :  { %v3587_v3 = vpop.eup %3586 }
 0x321   :  { %v3589_v4 = vpop.eup %3588  ;;  %v1020_v10 = vadd.f32 1.0, %v3587_v3 }
 0x323   :  { %3594 = vrcp.f32 %v1020_v10 }
 0x325   :  { %v3591_v6 = vpop.eup %3590 }
 0x326   :  { %v3593_v7 = vpop.eup %3592  ;;  %v1024_v8 = vmul.f32 %v3591_v6, %v3589_v4  ;;  %v1348_v4 = vld [vmem:[#allocation4 + $0x26] sm:$0x3] }
 0x327   :  { %v1023_v11 = vmul.f32 %v3593_v7, %v3915_v38  ;;  %v1031_v38 = vld [vmem:[#allocation4 + $0x1c] sm:$0x3] }
 0x329   :  { %v3947_v14 = vadd.f32 %v1024_v8, %v1023_v11 }
 0x32b   :  { %3596 = vtanh.f32 %v3947_v14 }
 0x32d   :  { %v3595_v15 = vpop.eup %3594 }
 0x335   :  { %v3597_v16 = vpop.eup %3596 }
 0x336   :  { %v1027_v17 = vmul.f32 %v3597_v16, %v3595_v15 }
 0x338   :  { %3120 = vmatmul.mubr.msk.f32.vlgmr.msra.gmra.mrb[12].mxu0 %vm84_vm2, %v1027_v17  ;;  %3131 = vmatmul.mubr.msk.f32.vlgmr.msra.gmra.mrb[12].mxu1 %vm84_vm2, %v1027_v17 }
 0x339   :  { %3428 = vmatpush3.bf16.msra.mxu0 %v3844_v19  ;;  %3434 = vmatpush3.bf16.msra.mxu1 %v3848_v20 }
 0x33a   :  { %3429 = vmatprep.subr.bf16.mxu0 %v3758_v0  ;;  %3435 = vmatprep.subr.bf16.mxu1 %v3758_v0 }
 0x33b   :  { %3141 = vmatprep.mubr.msk.f32.mxu0 %vm3760_vm1, %v3759_v1  ;;  %3152 = vmatprep.mubr.msk.f32.mxu1 %vm3760_vm1, %v3759_v1 }
 0x33d   :  { %3431 = vmatpush3.bf16.msra.mxu0 %v3854_v25  ;;  %3437 = vmatpush3.bf16.msra.mxu1 %v3858_v26 }
 0x33e   :  { %3438 = vmatprep.subr.bf16.mxu0 %v3758_v0  ;;  %3444 = vmatprep.subr.bf16.mxu1 %v3758_v0 }
 0x340   :  { %3142 = vmatmul.mubr.msk.f32.vlgmr.msra.gmra.mrb[14].mxu0 %vm84_vm2, %v1027_v17  ;;  %3153 = vmatmul.mubr.msk.f32.vlgmr.msra.gmra.mrb[14].mxu1 %vm84_vm2, %v1027_v17 }
 0x341   :  { %3440 = vmatpush3.bf16.msra.mxu0 %v3831_v5  ;;  %3446 = vmatpush3.bf16.msra.mxu1 %v3833_v9 }
 0x342   :  { %3441 = vmatprep.subr.bf16.mxu0 %v3758_v0  ;;  %3447 = vmatprep.subr.bf16.mxu1 %v3758_v0 }
 0x343   :  { %3163 = vmatprep.mubr.msk.f32.mxu0 %vm3760_vm1, %v3759_v1  ;;  %3174 = vmatprep.mubr.msk.f32.mxu1 %vm3760_vm1, %v3759_v1 }
 0x345   :  { %3443 = vmatpush3.bf16.msra.mxu0 %v3836_v12  ;;  %3449 = vmatpush3.bf16.msra.mxu1 %v3840_v13 }
 0x346   :  { %3450 = vmatprep.subr.bf16.mxu0 %v3758_v0  ;;  %3456 = vmatprep.subr.bf16.mxu1 %v3758_v0 }
 0x40b   :  { %v1102_v22 = vpop.f32.mrb[12].mxu0  ;;  %v1173_v23 = vpop.f32.mrb[12].mxu1 }
 0x40c   :  { %v1106_v24 = vadd.f32 %v1102_v22, %v1029_v18  ;;  %v1177_v27 = vadd.f32 %v1173_v23, %v1030_v21  ;;  %v3121_v28 = vpop.f32.mrb[13].mxu0  ;;  %v3132_v29 = vpop.f32.mrb[13].mxu1 }
 0x40e   :  { %v2779_v30 = vmul.f32 -1.442695, %v1106_v24  ;;  %v2780_v31 = vmul.f32 -1.442695, %v1177_v27 }
 0x410   :  { %3598 = vpow2.f32 %v2779_v30 }
 0x411   :  { %3600 = vpow2.f32 %v2780_v31 }
 0x413   :  { %v1244_v33 = vpop.f32.mrb[14].mxu0  ;;  %v1315_v34 = vpop.f32.mrb[14].mxu1 }
 0x414   :  { %v1319_v35 = vadd.f32 %v1315_v34, %v1032_v32  ;;  %v3143_v36 = vpop.f32.mrb[15].mxu0  ;;  %v3154_v37 = vpop.f32.mrb[15].mxu1  ;;  %v1248_v40 = vadd.f32 %v1244_v33, %v1031_v38 }
 0x415   :  { %v1661_v36 = vld [vmem:[#allocation4 + $0x28] sm:$0x3]  ;;  %v1662_v37 = vld [vmem:[#allocation4 + $0x2a] sm:$0x3] }
 0x416   :  { %v2781_v39 = vmul.f32 -1.442695, %v1319_v35 }
 0x418   :  { %3602 = vpow2.f32 %v2781_v39 }
 0x419   :  { %3604 = vtanh.f32 %v1248_v40 }
 0x41a   :  { %v3599_v41 = vpop.eup %3598 }
 0x41b   :  { %v3601_v42 = vpop.eup %3600  ;;  %v1323_v43 = vadd.f32 1.0, %v3599_v41 }
 0x41c   :  { %v1329_v44 = vadd.f32 1.0, %v3601_v42 }
 0x41d   :  { %3606 = vrcp.f32 %v1323_v43 }
 0x41e   :  { %3608 = vrcp.f32 %v1329_v44 }
 0x422   :  { %v3603_v45 = vpop.eup %3602 }
 0x423   :  { %v3605_v46 = vpop.eup %3604  ;;  %v1336_v50 = vadd.f32 1.0, %v3603_v45 }
 0x425   :  { %3610 = vrcp.f32 %v1336_v50 }
 0x427   :  { %v3607_v47 = vpop.eup %3606 }
 0x428   :  { %v3609_v48 = vpop.eup %3608  ;;  %v1340_v49 = vmul.f32 %v3607_v47, %v3605_v46  ;;  %v1664_v46 = vld [vmem:[#allocation4 + $0x2e] sm:$0x3] }
 0x429   :  { %v1339_v51 = vmul.f32 %v3609_v48, %v3947_v14  ;;  %v1347_v14 = vld [vmem:[#allocation4 + $0x24] sm:$0x3] }
 0x42b   :  { %v3979_v52 = vadd.f32 %v1340_v49, %v1339_v51 }
 0x42d   :  { %3612 = vtanh.f32 %v3979_v52 }
 0x42f   :  { %v3611_v53 = vpop.eup %3610 }
 0x437   :  { %v3613_v54 = vpop.eup %3612 }
 0x438   :  { %v1343_v55 = vmul.f32 %v3613_v54, %v3611_v53 }
 0x43a   :  { %3164 = vmatmul.mubr.msk.f32.vlgmr.msra.gmra.mrb[16].mxu0 %vm84_vm2, %v1343_v55  ;;  %3175 = vmatmul.mubr.msk.f32.vlgmr.msra.gmra.mrb[16].mxu1 %vm84_vm2, %v1343_v55 }
 0x43b   :  { %3452 = vmatpush3.bf16.msra.mxu0 %v3844_v19  ;;  %3458 = vmatpush3.bf16.msra.mxu1 %v3848_v20 }
 0x43c   :  { %3453 = vmatprep.subr.bf16.mxu0 %v3758_v0  ;;  %3459 = vmatprep.subr.bf16.mxu1 %v3758_v0 }
 0x43d   :  { %3185 = vmatprep.mubr.msk.f32.mxu0 %vm3760_vm1, %v3759_v1  ;;  %3196 = vmatprep.mubr.msk.f32.mxu1 %vm3760_vm1, %v3759_v1 }
 0x43f   :  { %3455 = vmatpush3.bf16.msra.mxu0 %v3854_v25  ;;  %3461 = vmatpush3.bf16.msra.mxu1 %v3858_v26 }
 0x440   :  { %3462 = vmatprep.subr.bf16.mxu0 %v3758_v0  ;;  %3468 = vmatprep.subr.bf16.mxu1 %v3758_v0 }
 0x442   :  { %3186 = vmatmul.mubr.msk.f32.vlgmr.msra.gmra.mrb[18].mxu0 %vm84_vm2, %v1343_v55  ;;  %3197 = vmatmul.mubr.msk.f32.vlgmr.msra.gmra.mrb[18].mxu1 %vm84_vm2, %v1343_v55 }
 0x443   :  { %3464 = vmatpush3.bf16.msra.mxu0 %v3831_v5  ;;  %3470 = vmatpush3.bf16.msra.mxu1 %v3833_v9 }
 0x444   :  { %3465 = vmatprep.subr.bf16.mxu0 %v3758_v0  ;;  %3471 = vmatprep.subr.bf16.mxu1 %v3758_v0 }
 0x445   :  { %3207 = vmatprep.mubr.msk.f32.mxu0 %vm3760_vm1, %v3759_v1  ;;  %3218 = vmatprep.mubr.msk.f32.mxu1 %vm3760_vm1, %v3759_v1 }
 0x447   :  { %3467 = vmatpush3.bf16.msra.mxu0 %v3836_v12  ;;  %3473 = vmatpush3.bf16.msra.mxu1 %v3840_v13 }
 0x448   :  { %3474 = vmatprep.subr.bf16.mxu0 %v3758_v0  ;;  %3480 = vmatprep.subr.bf16.mxu1 %v3758_v0 }
 0x50d   :  { %v1418_v58 = vpop.f32.mrb[16].mxu0  ;;  %v1489_v59 = vpop.f32.mrb[16].mxu1 }
 0x50e   :  { %v1422_v60 = vadd.f32 %v1418_v58, %v1345_v56  ;;  %v1493_v61 = vadd.f32 %v1489_v59, %v1346_v57  ;;  %v3165_v62 = vpop.f32.mrb[17].mxu0  ;;  %v3176_v63 = vpop.f32.mrb[17].mxu1 }
 0x510   :  { %v2786_v2 = vmul.f32 -1.442695, %v1422_v60  ;;  %v2787_v3 = vmul.f32 -1.442695, %v1493_v61 }
 0x512   :  { %3614 = vpow2.f32 %v2786_v2 }
 0x513   :  { %3616 = vpow2.f32 %v2787_v3 }
 0x515   :  { %v1560_v6 = vpop.f32.mrb[18].mxu0  ;;  %v1631_v7 = vpop.f32.mrb[18].mxu1 }
 0x516   :  { %v1635_v8 = vadd.f32 %v1631_v7, %v1348_v4  ;;  %v3187_v10 = vpop.f32.mrb[19].mxu0  ;;  %v3198_v11 = vpop.f32.mrb[19].mxu1  ;;  %v1564_v16 = vadd.f32 %v1560_v6, %v1347_v14 }
 0x518   :  { %v2788_v15 = vmul.f32 -1.442695, %v1635_v8 }
 0x51a   :  { %3618 = vpow2.f32 %v2788_v15 }
 0x51b   :  { %3620 = vtanh.f32 %v1564_v16 }
 0x51c   :  { %v3615_v17 = vpop.eup %3614 }
 0x51d   :  { %v3617_v18 = vpop.eup %3616  ;;  %v1639_v21 = vadd.f32 1.0, %v3615_v17 }
 0x51e   :  { %v1645_v22 = vadd.f32 1.0, %v3617_v18 }
 0x51f   :  { %3622 = vrcp.f32 %v1639_v21 }
 0x520   :  { %3624 = vrcp.f32 %v1645_v22  ;;  %v1980_v22 = vld [vmem:[#allocation4 + $0x36] sm:$0x3] }
 0x524   :  { %v3619_v23 = vpop.eup %3618 }
 0x525   :  { %v3621_v24 = vpop.eup %3620  ;;  %v1652_v30 = vadd.f32 1.0, %v3619_v23 }
 0x527   :  { %3626 = vrcp.f32 %v1652_v30 }
 0x529   :  { %v3623_v27 = vpop.eup %3622 }
 0x52a   :  { %v3625_v28 = vpop.eup %3624  ;;  %v1656_v29 = vmul.f32 %v3623_v27, %v3621_v24 }
 0x52b   :  { %v1655_v31 = vmul.f32 %v3625_v28, %v3979_v52  ;;  %v1663_v52 = vld [vmem:[#allocation4 + $0x2c] sm:$0x3]  ;;  %v1979_v28 = vld [vmem:[#allocation4 + $0x34] sm:$0x3] }
 0x52d   :  { %v4011_v32 = vadd.f32 %v1656_v29, %v1655_v31 }
 0x52f   :  { %3628 = vtanh.f32 %v4011_v32 }
 0x531   :  { %v3627_v33 = vpop.eup %3626 }
 0x539   :  { %v3629_v34 = vpop.eup %3628 }
 0x53a   :  { %v1659_v35 = vmul.f32 %v3629_v34, %v3627_v33 }
 0x53c   :  { %3208 = vmatmul.mubr.msk.f32.vlgmr.msra.gmra.mrb[20].mxu0 %vm84_vm2, %v1659_v35  ;;  %3219 = vmatmul.mubr.msk.f32.vlgmr.msra.gmra.mrb[20].mxu1 %vm84_vm2, %v1659_v35 }
 0x53d   :  { %3476 = vmatpush3.bf16.msra.mxu0 %v3844_v19  ;;  %3482 = vmatpush3.bf16.msra.mxu1 %v3848_v20 }
 0x53e   :  { %3477 = vmatprep.subr.bf16.mxu0 %v3758_v0  ;;  %3483 = vmatprep.subr.bf16.mxu1 %v3758_v0 }
 0x53f   :  { %3229 = vmatprep.mubr.msk.f32.mxu0 %vm3760_vm1, %v3759_v1  ;;  %3240 = vmatprep.mubr.msk.f32.mxu1 %vm3760_vm1, %v3759_v1 }
 0x541   :  { %3479 = vmatpush3.bf16.msra.mxu0 %v3854_v25  ;;  %3485 = vmatpush3.bf16.msra.mxu1 %v3858_v26 }
 0x542   :  { %3486 = vmatprep.subr.bf16.mxu0 %v3758_v0  ;;  %3492 = vmatprep.subr.bf16.mxu1 %v3758_v0 }
 0x544   :  { %3230 = vmatmul.mubr.msk.f32.vlgmr.msra.gmra.mrb[22].mxu0 %vm84_vm2, %v1659_v35  ;;  %3241 = vmatmul.mubr.msk.f32.vlgmr.msra.gmra.mrb[22].mxu1 %vm84_vm2, %v1659_v35 }
 0x545   :  { %3488 = vmatpush3.bf16.msra.mxu0 %v3831_v5  ;;  %3494 = vmatpush3.bf16.msra.mxu1 %v3833_v9 }
 0x546   :  { %3489 = vmatprep.subr.bf16.mxu0 %v3758_v0  ;;  %3495 = vmatprep.subr.bf16.mxu1 %v3758_v0 }
 0x547   :  { %3251 = vmatprep.mubr.msk.f32.mxu0 %vm3760_vm1, %v3759_v1  ;;  %3262 = vmatprep.mubr.msk.f32.mxu1 %vm3760_vm1, %v3759_v1 }
 0x549   :  { %3491 = vmatpush3.bf16.msra.mxu0 %v3836_v12  ;;  %3497 = vmatpush3.bf16.msra.mxu1 %v3840_v13 }
 0x54a   :  { %3498 = vmatprep.subr.bf16.mxu0 %v3758_v0  ;;  %3504 = vmatprep.subr.bf16.mxu1 %v3758_v0 }
 0x60f   :  { %v1734_v38 = vpop.f32.mrb[20].mxu0  ;;  %v1805_v39 = vpop.f32.mrb[20].mxu1 }
 0x610   :  { %v1738_v40 = vadd.f32 %v1734_v38, %v1661_v36  ;;  %v1809_v41 = vadd.f32 %v1805_v39, %v1662_v37  ;;  %v3209_v42 = vpop.f32.mrb[21].mxu0  ;;  %v3220_v43 = vpop.f32.mrb[21].mxu1 }
 0x612   :  { %v2793_v44 = vmul.f32 -1.442695, %v1738_v40  ;;  %v2794_v45 = vmul.f32 -1.442695, %v1809_v41 }
 0x614   :  { %3630 = vpow2.f32 %v2793_v44 }
 0x615   :  { %3632 = vpow2.f32 %v2794_v45 }
 0x617   :  { %v1876_v47 = vpop.f32.mrb[22].mxu0  ;;  %v1947_v48 = vpop.f32.mrb[22].mxu1 }
 0x618   :  { %v1951_v49 = vadd.f32 %v1947_v48, %v1664_v46  ;;  %v3231_v50 = vpop.f32.mrb[23].mxu0  ;;  %v3242_v51 = vpop.f32.mrb[23].mxu1  ;;  %v1880_v54 = vadd.f32 %v1876_v47, %v1663_v52  ;;  %v2655_v46 = vld [vmem:[%s4139_s4 + $0x18] sm:$0xff] }
 0x619   :  { %v2294_v48 = vld [vmem:[#allocation4 + $0x3a] sm:$0x3] }
 0x61a   :  { %v2795_v53 = vmul.f32 -1.442695, %v1951_v49 }
 0x61c   :  { %3634 = vpow2.f32 %v2795_v53 }
 0x61d   :  { %3636 = vtanh.f32 %v1880_v54 }
 0x61e   :  { %v3631_v55 = vpop.eup %3630 }
 0x61f   :  { %v3633_v56 = vpop.eup %3632  ;;  %v1955_v57 = vadd.f32 1.0, %v3631_v55 }
 0x620   :  { %v1961_v58 = vadd.f32 1.0, %v3633_v56 }
 0x621   :  { %3638 = vrcp.f32 %v1955_v57  ;;  %v2296_v57 = vld [vmem:[#allocation4 + $0x3e] sm:$0x3] }
 0x622   :  { %3640 = vrcp.f32 %v1961_v58 }
 0x626   :  { %v3635_v59 = vpop.eup %3634 }
 0x627   :  { %v3637_v60 = vpop.eup %3636  ;;  %v1968_v2 = vadd.f32 1.0, %v3635_v59 }
 0x629   :  { %3642 = vrcp.f32 %v1968_v2 }
 0x62b   :  { %v3639_v61 = vpop.eup %3638 }
 0x62c   :  { %v3641_v62 = vpop.eup %3640  ;;  %v1972_v63 = vmul.f32 %v3639_v61, %v3637_v60 }
 0x62d   :  { %v1971_v3 = vmul.f32 %v3641_v62, %v4011_v32 }
 0x62f   :  { %v4043_v4 = vadd.f32 %v1972_v63, %v1971_v3 }
 0x631   :  { %3644 = vtanh.f32 %v4043_v4 }
 0x633   :  { %v3643_v6 = vpop.eup %3642 }
 0x63b   :  { %v3645_v7 = vpop.eup %3644 }
 0x63c   :  { %v1975_v8 = vmul.f32 %v3645_v7, %v3643_v6 }
 0x63e   :  { %3252 = vmatmul.mubr.msk.f32.vlgmr.msra.gmra.mrb[24].mxu0 %vm84_vm2, %v1975_v8  ;;  %3263 = vmatmul.mubr.msk.f32.vlgmr.msra.gmra.mrb[24].mxu1 %vm84_vm2, %v1975_v8 }
 0x63f   :  { %3500 = vmatpush3.bf16.msra.mxu0 %v3844_v19  ;;  %3506 = vmatpush3.bf16.msra.mxu1 %v3848_v20 }
 0x640   :  { %3501 = vmatprep.subr.bf16.mxu0 %v3758_v0  ;;  %3507 = vmatprep.subr.bf16.mxu1 %v3758_v0 }
 0x641   :  { %3273 = vmatprep.mubr.msk.f32.mxu0 %vm3760_vm1, %v3759_v1  ;;  %3284 = vmatprep.mubr.msk.f32.mxu1 %vm3760_vm1, %v3759_v1 }
 0x643   :  { %3503 = vmatpush3.bf16.msra.mxu0 %v3854_v25  ;;  %3509 = vmatpush3.bf16.msra.mxu1 %v3858_v26 }
 0x644   :  { %3510 = vmatprep.subr.bf16.mxu0 %v3758_v0  ;;  %3516 = vmatprep.subr.bf16.mxu1 %v3758_v0 }
 0x646   :  { %3274 = vmatmul.mubr.msk.f32.vlgmr.msra.gmra.mrb[26].mxu0 %vm84_vm2, %v1975_v8  ;;  %3285 = vmatmul.mubr.msk.f32.vlgmr.msra.gmra.mrb[26].mxu1 %vm84_vm2, %v1975_v8 }
 0x647   :  { %3512 = vmatpush3.bf16.msra.mxu0 %v3831_v5  ;;  %3518 = vmatpush3.bf16.msra.mxu1 %v3833_v9  ;;  %v1977_v5 = vld [vmem:[#allocation4 + $0x30] sm:$0x3]  ;;  %v1978_v9 = vld [vmem:[#allocation4 + $0x32] sm:$0x3] }
 0x648   :  { %3513 = vmatprep.subr.bf16.mxu0 %v3758_v0  ;;  %3519 = vmatprep.subr.bf16.mxu1 %v3758_v0 }
 0x649   :  { %3295 = vmatprep.mubr.msk.f32.mxu0 %vm3760_vm1, %v3759_v1  ;;  %3306 = vmatprep.mubr.msk.f32.mxu1 %vm3760_vm1, %v3759_v1 }
 0x64b   :  { %3515 = vmatpush3.bf16.msra.mxu0 %v3836_v12  ;;  %3521 = vmatpush3.bf16.msra.mxu1 %v3840_v13 }
 0x64c   :  { %3522 = vmatprep.subr.bf16.mxu0 %v3758_v0  ;;  %3528 = vmatprep.subr.bf16.mxu1 %v3758_v0 }
 0x711   :  { %v2050_v10 = vpop.f32.mrb[24].mxu0  ;;  %v2121_v11 = vpop.f32.mrb[24].mxu1 }
 0x712   :  { %v2054_v14 = vadd.f32 %v2050_v10, %v1977_v5  ;;  %v2125_v15 = vadd.f32 %v2121_v11, %v1978_v9  ;;  %v3253_v16 = vpop.f32.mrb[25].mxu0  ;;  %v3264_v17 = vpop.f32.mrb[25].mxu1 }
 0x714   :  { %v2800_v18 = vmul.f32 -1.442695, %v2054_v14  ;;  %v2801_v21 = vmul.f32 -1.442695, %v2125_v15 }
 0x716   :  { %3646 = vpow2.f32 %v2800_v18 }
 0x717   :  { %3648 = vpow2.f32 %v2801_v21 }
 0x719   :  { %v2192_v12 = vpop.f32.mrb[26].mxu0  ;;  %v2263_v23 = vpop.f32.mrb[26].mxu1 }
 0x71a   :  { %v2267_v13 = vadd.f32 %v2263_v23, %v1980_v22  ;;  %v3275_v24 = vpop.f32.mrb[27].mxu0  ;;  %v3286_v27 = vpop.f32.mrb[27].mxu1  ;;  %v2196_v30 = vadd.f32 %v2192_v12, %v1979_v28 }
 0x71c   :  { %v2802_v29 = vmul.f32 -1.442695, %v2267_v13 }
 0x71e   :  { %3650 = vpow2.f32 %v2802_v29 }
 0x71f   :  { %3652 = vtanh.f32 %v2196_v30 }
 0x720   :  { %v3647_v31 = vpop.eup %3646 }
 0x721   :  { %v3649_v32 = vpop.eup %3648  ;;  %v2271_v33 = vadd.f32 1.0, %v3647_v31 }
 0x722   :  { %v2277_v34 = vadd.f32 1.0, %v3649_v32 }
 0x723   :  { %3654 = vrcp.f32 %v2271_v33 }
 0x724   :  { %3656 = vrcp.f32 %v2277_v34 }
 0x728   :  { %v3651_v35 = vpop.eup %3650 }
 0x729   :  { %v3653_v36 = vpop.eup %3652  ;;  %v2284_v40 = vadd.f32 1.0, %v3651_v35 }
 0x72b   :  { %3658 = vrcp.f32 %v2284_v40 }
 0x72d   :  { %v3655_v37 = vpop.eup %3654 }
 0x72e   :  { %v3657_v38 = vpop.eup %3656  ;;  %v2288_v39 = vmul.f32 %v3655_v37, %v3653_v36 }
 0x72f   :  { %v2287_v41 = vmul.f32 %v3657_v38, %v4043_v4 }
 0x731   :  { %v4075_v42 = vadd.f32 %v2288_v39, %v2287_v41 }
 0x733   :  { %3660 = vtanh.f32 %v4075_v42 }
 0x735   :  { %v3659_v43 = vpop.eup %3658 }
 0x73d   :  { %v3661_v44 = vpop.eup %3660 }
 0x73e   :  { %v2291_v45 = vmul.f32 %v3661_v44, %v3659_v43  ;;  %v2811_v44 = vld [vmem:[%s4138_s3] ss:$0 sm:$0xff] }
 0x740   :  { %3296 = vmatmul.mubr.msk.f32.vlgmr.msra.gmra.mrb[28].mxu0 %vm84_vm2, %v2291_v45  ;;  %3307 = vmatmul.mubr.msk.f32.vlgmr.msra.gmra.mrb[28].mxu1 %vm84_vm2, %v2291_v45 }
 0x741   :  { %3524 = vmatpush3.bf16.msra.mxu0 %v3844_v19  ;;  %3530 = vmatpush3.bf16.msra.mxu1 %v3848_v20  ;;  %v2652_v19 = vld [vmem:[%s4139_s4] sm:$0xff]  ;;  %v2653_v20 = vld [vmem:[%s4139_s4 + $0x8] sm:$0xff] }
 0x742   :  { %3525 = vmatprep.subr.bf16.mxu0 %v3758_v0  ;;  %3531 = vmatprep.subr.bf16.mxu1 %v3758_v0 }
 0x743   :  { %3317 = vmatprep.mubr.msk.f32.mxu0 %vm3760_vm1, %v3759_v1  ;;  %3328 = vmatprep.mubr.msk.f32.mxu1 %vm3760_vm1, %v3759_v1 }
 0x745   :  { %3527 = vmatpush3.bf16.msra.mxu0 %v3854_v25  ;;  %3533 = vmatpush3.bf16.msra.mxu1 %v3858_v26  ;;  %v2654_v25 = vld [vmem:[%s4139_s4 + $0x10] sm:$0xff]  ;;  %v3535_v26 = vpack.c.bf16 %v2653_v20, %v2652_v19  ;;  %v2812_v20 = vld [vmem:[%s4140_s5] ss:$0 sm:$0xff] }
 0x746   :  { %3534 = vmatprep.subr.bf16.mxu0 %v3758_v0  ;;  %v3538_v47 = vpack.c.bf16 %v2655_v46, %v2654_v25 }
 0x748   :  { %3318 = vmatmul.mubr.msk.f32.vlgmr.msra.gmra.mrb[30].mxu0 %vm84_vm2, %v2291_v45  ;;  %3329 = vmatmul.mubr.msk.f32.vlgmr.msra.gmra.mrb[30].mxu1 %vm84_vm2, %v2291_v45 }
 0x749   :  { %3339 = vmatprep.mubr.msk.f32.mxu0 %vm3760_vm1, %v3759_v1  ;;  %3536 = vmatpush3.bf16.msra.mxu0 %v3535_v26  ;;  %v2293_v1 = vld [vmem:[#allocation4 + $0x38] sm:$0x3] }
 0x74a   :  { %3537 = vmatprep.subr.bf16.mxu0 %v3758_v0  ;;  %v2295_v0 = vld [vmem:[#allocation4 + $0x3c] sm:$0x3] }
 0x74d   :  { %3539 = vmatpush3.bf16.msra.mxu0 %v3538_v47 }
 0x813   :  { %v2366_v49 = vpop.f32.mrb[28].mxu0  ;;  %v2437_v50 = vpop.f32.mrb[28].mxu1 }
 0x814   :  { %v2370_v51 = vadd.f32 %v2366_v49, %v2293_v1  ;;  %v2441_v52 = vadd.f32 %v2437_v50, %v2294_v48  ;;  %v3297_v53 = vpop.f32.mrb[29].mxu0  ;;  %v3308_v54 = vpop.f32.mrb[29].mxu1 }
 0x816   :  { %v2807_v55 = vmul.f32 -1.442695, %v2370_v51  ;;  %v2808_v56 = vmul.f32 -1.442695, %v2441_v52 }
 0x818   :  { %3662 = vpow2.f32 %v2807_v55 }
 0x819   :  { %3664 = vpow2.f32 %v2808_v56 }
 0x81b   :  { %v2508_v58 = vpop.f32.mrb[30].mxu0  ;;  %v2579_v59 = vpop.f32.mrb[30].mxu1 }
 0x81c   :  { %v2583_v60 = vadd.f32 %v2579_v59, %v2296_v57  ;;  %v3319_v61 = vpop.f32.mrb[31].mxu0  ;;  %v3330_v62 = vpop.f32.mrb[31].mxu1  ;;  %v2512_v2 = vadd.f32 %v2508_v58, %v2295_v0 }
 0x81e   :  { %v2809_v63 = vmul.f32 -1.442695, %v2583_v60 }
 0x820   :  { %3666 = vpow2.f32 %v2809_v63 }
 0x821   :  { %3668 = vtanh.f32 %v2512_v2 }
 0x822   :  { %v3663_v3 = vpop.eup %3662 }
 0x823   :  { %v3665_v4 = vpop.eup %3664  ;;  %v2587_v6 = vadd.f32 1.0, %v3663_v3 }
 0x824   :  { %v2593_v7 = vadd.f32 1.0, %v3665_v4 }
 0x825   :  { %3670 = vrcp.f32 %v2587_v6 }
 0x826   :  { %3672 = vrcp.f32 %v2593_v7 }
 0x82a   :  { %v3667_v8 = vpop.eup %3666 }
 0x82b   :  { %v3669_v5 = vpop.eup %3668  ;;  %v2600_v14 = vadd.f32 1.0, %v3667_v8 }
 0x82d   :  { %3674 = vrcp.f32 %v2600_v14 }
 0x82f   :  { %v3671_v9 = vpop.eup %3670 }
 0x830   :  { %v3673_v10 = vpop.eup %3672  ;;  %v2604_v11 = vmul.f32 %v3671_v9, %v3669_v5 }
 0x831   :  { %v2603_v15 = vmul.f32 %v3673_v10, %v4075_v42  ;;  %v2810_v42 = vld [vmem:[%s4137_s2] ss:$0 sm:$0xff]  ;;  %s3724_s2 = scalar_lea.vmem %s2745_s13, 32 }
 0x832   :  { %p3725_p2 = scmp.ne.s32.totalorder %s2745_s13, %s3724_s2  ;;  %p3730_p4 = scmp.lt.s32.totalorder %s3724_s2, %s3724_s2 }
 0x833   :  { %v2605_v16 = vadd.f32 %v2604_v11, %v2603_v15 }
 0x834   :  { %p3731_p5 = por %p3730_p4, %p3729_p3 }
 0x835   :  { %3676 = vtanh.f32 %v2605_v16  ;;  %2610 = vst.msk [vmem:[#allocation3] sm:$0x3] %vm56_vm0, %v2605_v16 }
 0x836   :  { %p3732_p6 = pnand %p3731_p5, %p3725_p2 }
 0x837   :  { %v3675_v17 = vpop.eup %3674 }
 0x83f   :  { %v3677_v18 = vpop.eup %3676 }
 0x840   :  { %v2607_v21 = vmul.f32 %v3677_v18, %v3675_v17 }
 0x842   :  { %2609 = vst.msk [vmem:[#allocation2] sm:$0x3] %vm56_vm0, %v2607_v21  ;;  %v2614_v22 = vsel %vm56_vm0, %v2607_v21, 0.0 }
 0x843   :  { %v2615_v12 = vrot.slane %v2614_v22, 4 }
 0x845   :  { %v2616_v23 = vadd.f32 %v2615_v12, %v2614_v22 }
 0x847   :  { %v2617_v13 = vrot.slane %v2616_v23, 2 }
 0x849   :  { %v2618_v24 = vadd.f32 %v2617_v13, %v2616_v23 }
 0x84b   :  { %v2619_v27 = vrot.slane %v2618_v24, 1 }
 0x84d   :  { %v2620_v28 = vadd.f32 %v2619_v27, %v2618_v24 }
 0x84f   :  { %v2622_v29 = vmul.f32 0.5, %v2620_v28 }
 0x851   :  { %v2623_v30 = vsub.f32 %v2607_v21, %v2622_v29 }
 0x853   :  { %v2624_v31 = vmul.f32 %v2623_v30, %v2623_v30 }
 0x855   :  { %v2625_v32 = vsel %vm56_vm0, %v2624_v31, 0.0 }
 0x856   :  { %v2626_v33 = vrot.slane %v2625_v32, 4 }
 0x858   :  { %v2627_v34 = vadd.f32 %v2626_v33, %v2625_v32 }
 0x85a   :  { %v2628_v35 = vrot.slane %v2627_v34, 2 }
 0x85c   :  { %v2629_v36 = vadd.f32 %v2628_v35, %v2627_v34 }
 0x85e   :  { %v2630_v37 = vrot.slane %v2629_v36, 1 }
 0x860   :  { %v2631_v38 = vadd.f32 %v2630_v37, %v2629_v36 }
 0x862   :  { %v2632_v39 = vmul.f32 0.5, %v2631_v38 }
 0x864   :  { %v2633_v40 = vadd.f32 1e-05, %v2632_v39 }
 0x866   :  { %3678 = vrsqrt.f32 %v2633_v40 }
 0x870   :  { %v3679_v41 = vpop.eup %3678 }
 0x871   :  { %v2635_v43 = vmul.f32 %v3679_v41, %v2623_v30 }
 0x873   :  { %v2643_v45 = vmul.f32 %v2810_v42, %v2635_v43 }
 0x875   :  { %v2651_v19 = vadd.f32 %v2811_v44, %v2643_v45 }
 0x877   :  { %3340 = vmatmul.mubr.msk.f32.vlgmr.msra.gmra.mrb[32].mxu0 %vm84_vm2, %v2651_v19 }
 0x94a   :  { %v2732_v25 = vpop.f32.mrb[32].mxu0 }
 0x94b   :  { %v2733_v26 = vadd.f32 %v2812_v20, %v2732_v25  ;;  %v3341_v46 = vpop.f32.mrb[33].mxu0 }
 0x94d   :  { %2737 = vst.msk [vmem:[#allocation9] sm:$0x3] %vm2736_vm3, %v2733_v26 }
 0x94e   :  { %3735 = shalt.err (!%p3732_p6)
}
 0x94f   :  { %s3736_s15 = scalar_lea.hbm %s4141_s6, 32 }
 0x950   :  { %p3737_p7 = scmp.ne.s32.totalorder %s4141_s6, %s3736_s15  ;;  %p3740_p8 = scmp.lt.u32.totalorder %s3736_s15, %s4141_s6 }
 0x952   :  { %p3742_p9 = pnand %p3740_p8, %p3737_p7 }
 0x954   :  { %3745 = shalt.err (!%p3742_p9)
}
 0x955   :  { %2747 = dma.vmem_to_hbm [thread:$0]  %s2745_s13, 32, %s4141_s6, [#allocation6]  }
 0x956   :  { %3750 = dma.done.wait [#allocation6], 32  }
 0x957   :  { %3751 = vsyncadd [#allocation6], 4294967264 }
 0x958   :  { %2751 = vsyncpa [#allocation5], 1 }
 0x959   :  { %2752 = vsyncpa [#allocation8], 1 }
 0x95a   :  { %2753 = vsyncpa [#allocation6], 1 }

</bundles_post_ra>
